<compile_context>
chip_gen: v7x
topology: tpu7x:2x2x1
jax: 0.10.0
libtpu: 0.0.40
codegen_flags: <defaults>
</compile_context>

<pallas_src>
import numpy as np
import jax
import jax.numpy as jnp
from jax.experimental import pallas as pl
from jax.experimental.pallas import tpu as pltpu

HIDDEN = 32      # args.hidden_size
DEPTH = 3        # args.depth
ATOM_FDIM = 16
BOND_FDIM = 24   # atom_fdim + bond features (bond-message convention)


# ------------------------------ fused kernel -------------------------------

def mpn_fused_kernel(fb2_ref, fa_ref, e_ref, o_ref, et_ref, ot_ref, scope_ref,
                     wi2_ref, wh2_ref, woa_ref, wom_ref, bo_ref, out_ref):
    f32 = jnp.float32
    H, H2 = HIDDEN, 2 * HIDDEN

    def dot(a, b):
        return jnp.dot(a, b, preferred_element_type=f32)

    def band(rows, cols, diag):
        # band(r, c, d)[i, j] = 1.0 where j - i == d (iota-built constant, no HBM traffic)
        i = jax.lax.broadcasted_iota(jnp.int32, (rows, cols), 0)
        j = jax.lax.broadcasted_iota(jnp.int32, (rows, cols), 1)
        return (j - i == diag).astype(f32)

    # constant projections for the paired (fwd|rev) lane layout, hoisted before the loop
    p_even = band(H2, H, 0)                      # m @ p_even -> forward-bond half
    p_odd = band(H2, H, -H)                      # m @ p_odd  -> reverse-bond half
    e_even = band(H, H2, 0)                      # embed (NP,H) into forward half
    e_odd = band(H, H2, H)                       # embed (NP,H) into reverse half
    swap = band(H2, H2, H) + band(H2, H2, -H)    # swap halves == message[b2revb]

    # one-hot bond->atom selectors (bf16 in HBM, f32 for compute)
    E = e_ref[...].astype(f32)    # (NP, NA): source atom of the forward bond of pair p
    O = o_ref[...].astype(f32)    # (NP, NA): source atom of the reverse bond
    Et = et_ref[...].astype(f32)  # (NA, NP) = E^T
    Ot = ot_ref[...].astype(f32)  # (NA, NP) = O^T

    wh2 = wh2_ref[...]            # blockdiag(W_h, W_h), VMEM-resident for the whole loop

    # input = W_i(f_bonds); message = ReLU(input)   (paired layout, 64 lanes)
    inp = dot(fb2_ref[...], wi2_ref[...])
    msg = jnp.maximum(inp, 0.0)

    def atom_sum(m):
        # a_message[a] = sum of messages of bonds entering atom a
        # head(fwd_p) = src(rev_p) and head(rev_p) = src(fwd_p), hence Ot / Et.
        return dot(Ot, dot(m, p_even)) + dot(Et, dot(m, p_odd))   # (NA, H)

    for _ in range(DEPTH - 1):
        a_msg = atom_sum(msg)
        # a_message[b2a]: gather each pair's source-atom sums into both lane halves
        gath = dot(dot(E, a_msg), e_even) + dot(dot(O, a_msg), e_odd)   # (NP, 2H)
        rev = dot(msg, swap)                                             # message[b2revb]
        msg = jnp.maximum(inp + dot(gath - rev, wh2), 0.0)               # act(input + W_h(.))
        # dropout(p=0.0) is the identity at inference -> omitted.

    a_msg = atom_sum(msg)
    # atom_hiddens = ReLU(W_o([f_atoms, a_message]) + b)   (W_o split -> no concat)
    atom_h = jnp.maximum(
        dot(fa_ref[...], woa_ref[...]) + dot(a_msg, wom_ref[...]) + bo_ref[...], 0.0)
    # mean pool per molecule (a_scope) expressed as a (M, NA) matmul
    out_ref[...] = dot(scope_ref[...], atom_h)


# ------------------------------ MPN encoder --------------------------------

def mpn_encoder_forward(params, batch, n_mols):
    G, NP, FB2 = batch["fb2"].shape
    NA = batch["fa"].shape[1]
    M = batch["scope"].shape[1]
    H = HIDDEN

    def g_spec(r, c):   # per-graph operand: squeeze the graph axis
        return pl.BlockSpec((None, r, c), lambda g: (g, 0, 0))

    def w_spec(r, c):   # shared weights: same block every grid step
        return pl.BlockSpec((r, c), lambda g: (0, 0))

    mols = pl.pallas_call(
        mpn_fused_kernel,
        out_shape=jax.ShapeDtypeStruct((G, M, H), jnp.float32),
        grid=(G,),
        in_specs=[
            g_spec(NP, FB2),                 # paired bond features
            g_spec(NA, ATOM_FDIM),           # atom features
            g_spec(NP, NA),                  # E  (bf16)
            g_spec(NP, NA),                  # O  (bf16)
            g_spec(NA, NP),                  # E^T
            g_spec(NA, NP),                  # O^T
            g_spec(M, NA),                   # mean-pool scope matrix
            w_spec(2 * BOND_FDIM, 2 * H),    # blockdiag(W_i, W_i)
            w_spec(2 * H, 2 * H),            # blockdiag(W_h, W_h)
            w_spec(ATOM_FDIM, H),            # W_o (atom part)
            w_spec(H, H),                    # W_o (message part)
            w_spec(1, H),                    # b_o
        ],
        out_specs=pl.BlockSpec((None, M, H), lambda g: (g, 0, 0)),
        compiler_params=pltpu.CompilerParams(
            dimension_semantics=("parallel",)),   # v7x: one graph per TensorCore
    )(batch["fb2"], batch["fa"], batch["E"], batch["O"],
      batch["Et"], batch["Ot"], batch["scope"],
      params["Wi2"], params["Wh2"], params["Woa"], params["Wom"], params["bo"])

    return (mols[0] - mols[1])[:n_mols]          # ret[0] - ret[1]


# ------------------------- synthetic graph builder -------------------------

def _pad8(n):
    return ((n + 7) // 8) * 8


def build_batch_mol_graph(key, atoms_per_mol, max_nb=2):
    """Ring molecules.  Atom 0 is the zero-padding atom; bond pair 0 (bonds 0, 1) is the
    zero-padding pair.  Directed bonds are stored as adjacent (fwd, rev) pairs, so
    b2revb[b] == b ^ 1 everywhere."""
    n_atoms = 1 + sum(atoms_per_mol)
    n_pairs = 1 + sum(atoms_per_mol)             # a ring with A atoms has A edges
    na_pad = _pad8(n_atoms)
    np_pad = _pad8(n_pairs)
    nb = 2 * np_pad

    b2a = np.zeros((nb,), np.int32)
    b2revb = (np.arange(nb, dtype=np.int32) ^ 1)
    a2b_lists = [[] for _ in range(na_pad)]
    a_scope = []
    a_ptr, p_ptr = 1, 1
    for A in atoms_per_mol:
        a_scope.append((a_ptr, A))
        for k in range(A):
            u = a_ptr + k
            v = a_ptr + (k + 1) % A
            bf, br = 2 * p_ptr, 2 * p_ptr + 1    # fwd u->v, rev v->u
            b2a[bf], b2a[br] = u, v
            a2b_lists[v].append(bf)
            a2b_lists[u].append(br)
            p_ptr += 1
        a_ptr += A

    a2b = np.zeros((na_pad, max_nb), np.int32)
    for a, lst in enumerate(a2b_lists):
        a2b[a, :len(lst)] = lst

    k1, k2 = jax.random.split(key)
    f_atoms = np.array(jax.random.normal(k1, (na_pad, ATOM_FDIM), jnp.float32))
    f_atoms[0] = 0.0
    f_atoms[n_atoms:] = 0.0
    f_bonds = np.array(jax.random.normal(k2, (nb, BOND_FDIM), jnp.float32))
    real_pair = np.zeros((np_pad,), bool)
    real_pair[1:n_pairs] = True
    f_bonds[~np.repeat(real_pair, 2)] = 0.0      # padding bonds carry zero features

    # --- arrays consumed by the fused Pallas kernel ---
    fb2 = f_bonds.reshape(np_pad, 2 * BOND_FDIM)               # paired bond features
    E = np.zeros((np_pad, na_pad), np.float32)                 # src one-hot of fwd bond
    O = np.zeros((np_pad, na_pad), np.float32)                 # src one-hot of rev bond
    E[np.arange(np_pad), b2a[0::2]] = 1.0
    O[np.arange(np_pad), b2a[1::2]] = 1.0
    E *= real_pair[:, None]
    O *= real_pair[:, None]

    n_mols_pad = _pad8(len(atoms_per_mol))
    scope_mat = np.zeros((n_mols_pad, na_pad), np.float32)
    for i, (start, size) in enumerate(a_scope):
        if size > 0:                                           # size==0 -> zero vector
            scope_mat[i, start:start + size] = 1.0 / size

    bf16 = jnp.bfloat16     # selectors are 0/1 -> exact in bf16, half the HBM/VMEM
    return {
        # kernel inputs
        "fb2": jnp.asarray(fb2), "fa": jnp.asarray(f_atoms),
        "E": jnp.asarray(E, bf16), "O": jnp.asarray(O, bf16),
        "Et": jnp.asarray(E.T, bf16), "Ot": jnp.asarray(O.T, bf16),
        "scope": jnp.asarray(scope_mat),
        # raw chemprop-style components (pure-JAX reference only)
        "f_atoms": jnp.asarray(f_atoms), "f_bonds": jnp.asarray(f_bonds),
        "a2b": jnp.asarray(a2b), "b2a": jnp.asarray(b2a),
        "b2revb": jnp.asarray(b2revb), "a_scope": a_scope,
    }


def stack_graphs(g1, g2):
    keys = ["fb2", "fa", "E", "O", "Et", "Ot", "scope"]
    return {k: jnp.stack([g1[k], g2[k]], axis=0) for k in keys}


# ------------------------------ parameters ---------------------------------

def init_params(key):
    def lin(k, fan_in, fan_out):
        bound = 1.0 / np.sqrt(fan_in)
        return jax.random.uniform(k, (fan_in, fan_out), jnp.float32, -bound, bound)

    k1, k2, k3, k4 = jax.random.split(key, 4)
    Wi = lin(k1, BOND_FDIM, HIDDEN)               # W_i (bias=False)
    Wh = lin(k2, HIDDEN, HIDDEN)                  # W_h (bias=False)
    Wo = lin(k3, ATOM_FDIM + HIDDEN, HIDDEN)      # W_o
    bo_bound = 1.0 / np.sqrt(ATOM_FDIM + HIDDEN)
    bo = jax.random.uniform(k4, (1, HIDDEN), jnp.float32, -bo_bound, bo_bound)

    def blockdiag2(w):
        r, c = w.shape
        z = jnp.zeros((2 * r, 2 * c), w.dtype)
        return z.at[:r, :c].set(w).at[r:, c:].set(w)

    return {
        # raw weights (pure-JAX reference)
        "Wi": Wi, "Wh": Wh, "Wo": Wo, "bo": bo,
        # packed weights consumed by the fused kernel
        "Wi2": blockdiag2(Wi),                    # (2*BOND_FDIM, 2H)
        "Wh2": blockdiag2(Wh),                    # (2H, 2H)
        "Woa": Wo[:ATOM_FDIM],                    # (ATOM_FDIM, H)
        "Wom": Wo[ATOM_FDIM:],                    # (H, H)
    }


# --------------------------- pure-JAX reference ----------------------------

def reference_encode(params, g):
    f_atoms, f_bonds = g["f_atoms"], g["f_bonds"]
    a2b, b2a, b2revb, a_scope = g["a2b"], g["b2a"], g["b2revb"], g["a_scope"]
    inp = f_bonds @ params["Wi"]
    message = jnp.maximum(inp, 0.0)
    for _ in range(DEPTH - 1):
        a_msg = message[a2b].sum(axis=1)          # index_select_ND(message, a2b).sum(1)
        message = a_msg[b2a] - message[b2revb]
        message = jnp.maximum(inp + message @ params["Wh"], 0.0)
    a_msg = message[a2b].sum(axis=1)
    a_input = jnp.concatenate([f_atoms, a_msg], axis=1)
    atom_h = jnp.maximum(a_input @ params["Wo"] + params["bo"], 0.0)
    mol_vecs = []
    for (start, size) in a_scope:
        if size == 0:
            mol_vecs.append(jnp.zeros((HIDDEN,), jnp.float32))
        else:
            mol_vecs.append(atom_h[start:start + size].sum(0) / size)
    return jnp.stack(mol_vecs)


# ---------------------------------- main -----------------------------------

if __name__ == "__main__":
    key = jax.random.PRNGKey(0)
    kp, kg1, kg2 = jax.random.split(key, 3)
    params = init_params(kp)

    atoms_per_mol = [5, 6]                        # num_molecules = 2
    g1 = build_batch_mol_graph(kg1, atoms_per_mol)
    g2 = build_batch_mol_graph(kg2, atoms_per_mol)
    batch = stack_graphs(g1, g2)
    n_mols = len(atoms_per_mol)

    out = jax.block_until_ready(mpn_encoder_forward(params, batch, n_mols))

    ref = reference_encode(params, g1) - reference_encode(params, g2)
    ref = jax.block_until_ready(ref)

    assert out.shape == (n_mols, HIDDEN)
    assert np.all(np.isfinite(np.asarray(out)))
    assert np.allclose(np.asarray(out), np.asarray(ref), rtol=5e-2, atol=5e-2)
    # TODO(synk): use_input_features / features_only / atom_messages / undirected
    # non-default branches not exercised (defaults False); dropout(p=0) is identity.
    print("KERNEL_OK")
</pallas_src>

<mosaic_0001>
module attributes {stable_mosaic.version = 11 : i64} {
  func.func @mpn_fused_kernel(%arg0: i32, %arg1: memref<1x16x48xf32, #tpu.memory_space<vmem>>, %arg2: memref<1x16x16xf32, #tpu.memory_space<vmem>>, %arg3: memref<1x16x16xbf16, #tpu.memory_space<vmem>>, %arg4: memref<1x16x16xbf16, #tpu.memory_space<vmem>>, %arg5: memref<1x16x16xbf16, #tpu.memory_space<vmem>>, %arg6: memref<1x16x16xbf16, #tpu.memory_space<vmem>>, %arg7: memref<1x8x16xf32, #tpu.memory_space<vmem>>, %arg8: memref<48x64xf32, #tpu.memory_space<vmem>>, %arg9: memref<64x64xf32, #tpu.memory_space<vmem>>, %arg10: memref<16x32xf32, #tpu.memory_space<vmem>>, %arg11: memref<32x32xf32, #tpu.memory_space<vmem>>, %arg12: memref<1x32xf32, #tpu.memory_space<vmem>>, %arg13: memref<1x8x32xf32, #tpu.memory_space<vmem>>) attributes {dimension_semantics = [#tpu.dimension_semantics<parallel>], iteration_bounds = array<i64: 2>, scalar_prefetch = 0 : i64, scratch_operands = 0 : i64, tpu.core_type = #tpu.core_type<tc>, window_params = [{transform_indices = @transform_0, window_bounds = array<i64: 1, 16, 48>}, {transform_indices = @transform_1, window_bounds = array<i64: 1, 16, 16>}, {transform_indices = @transform_2, window_bounds = array<i64: 1, 16, 16>}, {transform_indices = @transform_3, window_bounds = array<i64: 1, 16, 16>}, {transform_indices = @transform_4, window_bounds = array<i64: 1, 16, 16>}, {transform_indices = @transform_5, window_bounds = array<i64: 1, 16, 16>}, {transform_indices = @transform_6, window_bounds = array<i64: 1, 8, 16>}, {pipeline_mode = #tpu.pipeline_mode<synchronous>, transform_indices = @transform_7, window_bounds = array<i64: 48, 64>}, {pipeline_mode = #tpu.pipeline_mode<synchronous>, transform_indices = @transform_8, window_bounds = array<i64: 64, 64>}, {pipeline_mode = #tpu.pipeline_mode<synchronous>, transform_indices = @transform_9, window_bounds = array<i64: 16, 32>}, {pipeline_mode = #tpu.pipeline_mode<synchronous>, transform_indices = @transform_10, window_bounds = array<i64: 32, 32>}, {pipeline_mode = #tpu.pipeline_mode<synchronous>, transform_indices = @transform_11, window_bounds = array<i64: 1, 32>}, {transform_indices = @transform_12, window_bounds = array<i64: 1, 8, 32>}]} {
    %0 = tpu.iota {dimensions = array<i32: 0>} : vector<64x32xi32>
    %1 = tpu.iota {dimensions = array<i32: 1>} : vector<64x32xi32>
    %2 = arith.subi %1, %0 : vector<64x32xi32>
    %c0_i32 = arith.constant 0 : i32
    %3 = vector.broadcast %c0_i32 : i32 to vector<64x32xi32>
    %4 = arith.cmpi eq, %2, %3 : vector<64x32xi32>
    %5 = arith.extui %4 : vector<64x32xi1> to vector<64x32xi32>
    %6 = arith.sitofp %5 : vector<64x32xi32> to vector<64x32xf32>
    %7 = tpu.iota {dimensions = array<i32: 0>} : vector<64x32xi32>
    %8 = tpu.iota {dimensions = array<i32: 1>} : vector<64x32xi32>
    %9 = arith.subi %8, %7 : vector<64x32xi32>
    %c-32_i32 = arith.constant -32 : i32
    %10 = vector.broadcast %c-32_i32 : i32 to vector<64x32xi32>
    %11 = arith.cmpi eq, %9, %10 : vector<64x32xi32>
    %12 = arith.extui %11 : vector<64x32xi1> to vector<64x32xi32>
    %13 = arith.sitofp %12 : vector<64x32xi32> to vector<64x32xf32>
    %14 = tpu.iota {dimensions = array<i32: 0>} : vector<32x64xi32>
    %15 = tpu.iota {dimensions = array<i32: 1>} : vector<32x64xi32>
    %16 = arith.subi %15, %14 : vector<32x64xi32>
    %c0_i32_0 = arith.constant 0 : i32
    %17 = vector.broadcast %c0_i32_0 : i32 to vector<32x64xi32>
    %18 = arith.cmpi eq, %16, %17 : vector<32x64xi32>
    %19 = arith.extui %18 : vector<32x64xi1> to vector<32x64xi32>
    %20 = arith.sitofp %19 : vector<32x64xi32> to vector<32x64xf32>
    %21 = tpu.iota {dimensions = array<i32: 0>} : vector<32x64xi32>
    %22 = tpu.iota {dimensions = array<i32: 1>} : vector<32x64xi32>
    %23 = arith.subi %22, %21 : vector<32x64xi32>
    %c32_i32 = arith.constant 32 : i32
    %24 = vector.broadcast %c32_i32 : i32 to vector<32x64xi32>
    %25 = arith.cmpi eq, %23, %24 : vector<32x64xi32>
    %26 = arith.extui %25 : vector<32x64xi1> to vector<32x64xi32>
    %27 = arith.sitofp %26 : vector<32x64xi32> to vector<32x64xf32>
    %28 = tpu.iota {dimensions = array<i32: 0>} : vector<64x64xi32>
    %29 = tpu.iota {dimensions = array<i32: 1>} : vector<64x64xi32>
    %30 = arith.subi %29, %28 : vector<64x64xi32>
    %c32_i32_1 = arith.constant 32 : i32
    %31 = vector.broadcast %c32_i32_1 : i32 to vector<64x64xi32>
    %32 = arith.cmpi eq, %30, %31 : vector<64x64xi32>
    %33 = arith.extui %32 : vector<64x64xi1> to vector<64x64xi32>
    %34 = arith.sitofp %33 : vector<64x64xi32> to vector<64x64xf32>
    %35 = tpu.iota {dimensions = array<i32: 0>} : vector<64x64xi32>
    %36 = tpu.iota {dimensions = array<i32: 1>} : vector<64x64xi32>
    %37 = arith.subi %36, %35 : vector<64x64xi32>
    %c-32_i32_2 = arith.constant -32 : i32
    %38 = vector.broadcast %c-32_i32_2 : i32 to vector<64x64xi32>
    %39 = arith.cmpi eq, %37, %38 : vector<64x64xi32>
    %40 = arith.extui %39 : vector<64x64xi1> to vector<64x64xi32>
    %41 = arith.sitofp %40 : vector<64x64xi32> to vector<64x64xf32>
    %42 = arith.addf %34, %41 : vector<64x64xf32>
    %c0 = arith.constant 0 : index
    %c0_3 = arith.constant 0 : index
    %c0_4 = arith.constant 0 : index
    %43 = vector.load %arg3[%c0, %c0_3, %c0_4] : memref<1x16x16xbf16, #tpu.memory_space<vmem>>, vector<1x16x16xbf16>
    %44 = vector.shape_cast %43 : vector<1x16x16xbf16> to vector<16x16xbf16>
    %45 = arith.extf %44 : vector<16x16xbf16> to vector<16x16xf32>
    %c0_5 = arith.constant 0 : index
    %c0_6 = arith.constant 0 : index
    %c0_7 = arith.constant 0 : index
    %46 = vector.load %arg4[%c0_5, %c0_6, %c0_7] : memref<1x16x16xbf16, #tpu.memory_space<vmem>>, vector<1x16x16xbf16>
    %47 = vector.shape_cast %46 : vector<1x16x16xbf16> to vector<16x16xbf16>
    %48 = arith.extf %47 : vector<16x16xbf16> to vector<16x16xf32>
    %c0_8 = arith.constant 0 : index
    %c0_9 = arith.constant 0 : index
    %c0_10 = arith.constant 0 : index
    %49 = vector.load %arg5[%c0_8, %c0_9, %c0_10] : memref<1x16x16xbf16, #tpu.memory_space<vmem>>, vector<1x16x16xbf16>
    %50 = vector.shape_cast %49 : vector<1x16x16xbf16> to vector<16x16xbf16>
    %51 = arith.extf %50 : vector<16x16xbf16> to vector<16x16xf32>
    %c0_11 = arith.constant 0 : index
    %c0_12 = arith.constant 0 : index
    %c0_13 = arith.constant 0 : index
    %52 = vector.load %arg6[%c0_11, %c0_12, %c0_13] : memref<1x16x16xbf16, #tpu.memory_space<vmem>>, vector<1x16x16xbf16>
    %53 = vector.shape_cast %52 : vector<1x16x16xbf16> to vector<16x16xbf16>
    %54 = arith.extf %53 : vector<16x16xbf16> to vector<16x16xf32>
    %c0_14 = arith.constant 0 : index
    %c0_15 = arith.constant 0 : index
    %55 = vector.load %arg9[%c0_14, %c0_15] : memref<64x64xf32, #tpu.memory_space<vmem>>, vector<64x64xf32>
    %c0_16 = arith.constant 0 : index
    %c0_17 = arith.constant 0 : index
    %c0_18 = arith.constant 0 : index
    %56 = vector.load %arg1[%c0_16, %c0_17, %c0_18] : memref<1x16x48xf32, #tpu.memory_space<vmem>>, vector<1x16x48xf32>
    %57 = vector.shape_cast %56 : vector<1x16x48xf32> to vector<16x48xf32>
    %c0_19 = arith.constant 0 : index
    %c0_20 = arith.constant 0 : index
    %58 = vector.load %arg8[%c0_19, %c0_20] : memref<48x64xf32, #tpu.memory_space<vmem>>, vector<48x64xf32>
    %cst = arith.constant dense<0.000000e+00> : vector<16x64xf32>
    %59 = tpu.matmul %57, %58, %cst {dimension_numbers = #tpu.dot_dimension_numbers<[1], [0], [0], [1], [0, 0, 1, 1], [], []>} : vector<16x48xf32>, vector<48x64xf32>, vector<16x64xf32> -> vector<16x64xf32>
    %cst_21 = arith.constant 0.000000e+00 : f32
    %60 = vector.broadcast %cst_21 : f32 to vector<16x64xf32>
    %61 = arith.maximumf %59, %60 : vector<16x64xf32>
    %cst_22 = arith.constant dense<0.000000e+00> : vector<16x32xf32>
    %62 = tpu.matmul %61, %6, %cst_22 {dimension_numbers = #tpu.dot_dimension_numbers<[1], [0], [0], [1], [0, 0, 1, 1], [], []>} : vector<16x64xf32>, vector<64x32xf32>, vector<16x32xf32> -> vector<16x32xf32>
    %cst_23 = arith.constant dense<0.000000e+00> : vector<16x32xf32>
    %63 = tpu.matmul %54, %62, %cst_23 {dimension_numbers = #tpu.dot_dimension_numbers<[1], [0], [0], [1], [0, 0, 1, 1], [], []>} : vector<16x16xf32>, vector<16x32xf32>, vector<16x32xf32> -> vector<16x32xf32>
    %cst_24 = arith.constant dense<0.000000e+00> : vector<16x32xf32>
    %64 = tpu.matmul %61, %13, %cst_24 {dimension_numbers = #tpu.dot_dimension_numbers<[1], [0], [0], [1], [0, 0, 1, 1], [], []>} : vector<16x64xf32>, vector<64x32xf32>, vector<16x32xf32> -> vector<16x32xf32>
    %cst_25 = arith.constant dense<0.000000e+00> : vector<16x32xf32>
    %65 = tpu.matmul %51, %64, %cst_25 {dimension_numbers = #tpu.dot_dimension_numbers<[1], [0], [0], [1], [0, 0, 1, 1], [], []>} : vector<16x16xf32>, vector<16x32xf32>, vector<16x32xf32> -> vector<16x32xf32>
    %66 = arith.addf %63, %65 : vector<16x32xf32>
    %cst_26 = arith.constant dense<0.000000e+00> : vector<16x32xf32>
    %67 = tpu.matmul %45, %66, %cst_26 {dimension_numbers = #tpu.dot_dimension_numbers<[1], [0], [0], [1], [0, 0, 1, 1], [], []>} : vector<16x16xf32>, vector<16x32xf32>, vector<16x32xf32> -> vector<16x32xf32>
    %cst_27 = arith.constant dense<0.000000e+00> : vector<16x64xf32>
    %68 = tpu.matmul %67, %20, %cst_27 {dimension_numbers = #tpu.dot_dimension_numbers<[1], [0], [0], [1], [0, 0, 1, 1], [], []>} : vector<16x32xf32>, vector<32x64xf32>, vector<16x64xf32> -> vector<16x64xf32>
    %cst_28 = arith.constant dense<0.000000e+00> : vector<16x32xf32>
    %69 = tpu.matmul %48, %66, %cst_28 {dimension_numbers = #tpu.dot_dimension_numbers<[1], [0], [0], [1], [0, 0, 1, 1], [], []>} : vector<16x16xf32>, vector<16x32xf32>, vector<16x32xf32> -> vector<16x32xf32>
    %cst_29 = arith.constant dense<0.000000e+00> : vector<16x64xf32>
    %70 = tpu.matmul %69, %27, %cst_29 {dimension_numbers = #tpu.dot_dimension_numbers<[1], [0], [0], [1], [0, 0, 1, 1], [], []>} : vector<16x32xf32>, vector<32x64xf32>, vector<16x64xf32> -> vector<16x64xf32>
    %71 = arith.addf %68, %70 : vector<16x64xf32>
    %cst_30 = arith.constant dense<0.000000e+00> : vector<16x64xf32>
    %72 = tpu.matmul %61, %42, %cst_30 {dimension_numbers = #tpu.dot_dimension_numbers<[1], [0], [0], [1], [0, 0, 1, 1], [], []>} : vector<16x64xf32>, vector<64x64xf32>, vector<16x64xf32> -> vector<16x64xf32>
    %73 = arith.subf %71, %72 : vector<16x64xf32>
    %cst_31 = arith.constant dense<0.000000e+00> : vector<16x64xf32>
    %74 = tpu.matmul %73, %55, %cst_31 {dimension_numbers = #tpu.dot_dimension_numbers<[1], [0], [0], [1], [0, 0, 1, 1], [], []>} : vector<16x64xf32>, vector<64x64xf32>, vector<16x64xf32> -> vector<16x64xf32>
    %75 = arith.addf %59, %74 : vector<16x64xf32>
    %cst_32 = arith.constant 0.000000e+00 : f32
    %76 = vector.broadcast %cst_32 : f32 to vector<16x64xf32>
    %77 = arith.maximumf %75, %76 : vector<16x64xf32>
    %cst_33 = arith.constant dense<0.000000e+00> : vector<16x32xf32>
    %78 = tpu.matmul %77, %6, %cst_33 {dimension_numbers = #tpu.dot_dimension_numbers<[1], [0], [0], [1], [0, 0, 1, 1], [], []>} : vector<16x64xf32>, vector<64x32xf32>, vector<16x32xf32> -> vector<16x32xf32>
    %cst_34 = arith.constant dense<0.000000e+00> : vector<16x32xf32>
    %79 = tpu.matmul %54, %78, %cst_34 {dimension_numbers = #tpu.dot_dimension_numbers<[1], [0], [0], [1], [0, 0, 1, 1], [], []>} : vector<16x16xf32>, vector<16x32xf32>, vector<16x32xf32> -> vector<16x32xf32>
    %cst_35 = arith.constant dense<0.000000e+00> : vector<16x32xf32>
    %80 = tpu.matmul %77, %13, %cst_35 {dimension_numbers = #tpu.dot_dimension_numbers<[1], [0], [0], [1], [0, 0, 1, 1], [], []>} : vector<16x64xf32>, vector<64x32xf32>, vector<16x32xf32> -> vector<16x32xf32>
    %cst_36 = arith.constant dense<0.000000e+00> : vector<16x32xf32>
    %81 = tpu.matmul %51, %80, %cst_36 {dimension_numbers = #tpu.dot_dimension_numbers<[1], [0], [0], [1], [0, 0, 1, 1], [], []>} : vector<16x16xf32>, vector<16x32xf32>, vector<16x32xf32> -> vector<16x32xf32>
    %82 = arith.addf %79, %81 : vector<16x32xf32>
    %cst_37 = arith.constant dense<0.000000e+00> : vector<16x32xf32>
    %83 = tpu.matmul %45, %82, %cst_37 {dimension_numbers = #tpu.dot_dimension_numbers<[1], [0], [0], [1], [0, 0, 1, 1], [], []>} : vector<16x16xf32>, vector<16x32xf32>, vector<16x32xf32> -> vector<16x32xf32>
    %cst_38 = arith.constant dense<0.000000e+00> : vector<16x64xf32>
    %84 = tpu.matmul %83, %20, %cst_38 {dimension_numbers = #tpu.dot_dimension_numbers<[1], [0], [0], [1], [0, 0, 1, 1], [], []>} : vector<16x32xf32>, vector<32x64xf32>, vector<16x64xf32> -> vector<16x64xf32>
    %cst_39 = arith.constant dense<0.000000e+00> : vector<16x32xf32>
    %85 = tpu.matmul %48, %82, %cst_39 {dimension_numbers = #tpu.dot_dimension_numbers<[1], [0], [0], [1], [0, 0, 1, 1], [], []>} : vector<16x16xf32>, vector<16x32xf32>, vector<16x32xf32> -> vector<16x32xf32>
    %cst_40 = arith.constant dense<0.000000e+00> : vector<16x64xf32>
    %86 = tpu.matmul %85, %27, %cst_40 {dimension_numbers = #tpu.dot_dimension_numbers<[1], [0], [0], [1], [0, 0, 1, 1], [], []>} : vector<16x32xf32>, vector<32x64xf32>, vector<16x64xf32> -> vector<16x64xf32>
    %87 = arith.addf %84, %86 : vector<16x64xf32>
    %cst_41 = arith.constant dense<0.000000e+00> : vector<16x64xf32>
    %88 = tpu.matmul %77, %42, %cst_41 {dimension_numbers = #tpu.dot_dimension_numbers<[1], [0], [0], [1], [0, 0, 1, 1], [], []>} : vector<16x64xf32>, vector<64x64xf32>, vector<16x64xf32> -> vector<16x64xf32>
    %89 = arith.subf %87, %88 : vector<16x64xf32>
    %cst_42 = arith.constant dense<0.000000e+00> : vector<16x64xf32>
    %90 = tpu.matmul %89, %55, %cst_42 {dimension_numbers = #tpu.dot_dimension_numbers<[1], [0], [0], [1], [0, 0, 1, 1], [], []>} : vector<16x64xf32>, vector<64x64xf32>, vector<16x64xf32> -> vector<16x64xf32>
    %91 = arith.addf %59, %90 : vector<16x64xf32>
    %cst_43 = arith.constant 0.000000e+00 : f32
    %92 = vector.broadcast %cst_43 : f32 to vector<16x64xf32>
    %93 = arith.maximumf %91, %92 : vector<16x64xf32>
    %cst_44 = arith.constant dense<0.000000e+00> : vector<16x32xf32>
    %94 = tpu.matmul %93, %6, %cst_44 {dimension_numbers = #tpu.dot_dimension_numbers<[1], [0], [0], [1], [0, 0, 1, 1], [], []>} : vector<16x64xf32>, vector<64x32xf32>, vector<16x32xf32> -> vector<16x32xf32>
    %cst_45 = arith.constant dense<0.000000e+00> : vector<16x32xf32>
    %95 = tpu.matmul %54, %94, %cst_45 {dimension_numbers = #tpu.dot_dimension_numbers<[1], [0], [0], [1], [0, 0, 1, 1], [], []>} : vector<16x16xf32>, vector<16x32xf32>, vector<16x32xf32> -> vector<16x32xf32>
    %cst_46 = arith.constant dense<0.000000e+00> : vector<16x32xf32>
    %96 = tpu.matmul %93, %13, %cst_46 {dimension_numbers = #tpu.dot_dimension_numbers<[1], [0], [0], [1], [0, 0, 1, 1], [], []>} : vector<16x64xf32>, vector<64x32xf32>, vector<16x32xf32> -> vector<16x32xf32>
    %cst_47 = arith.constant dense<0.000000e+00> : vector<16x32xf32>
    %97 = tpu.matmul %51, %96, %cst_47 {dimension_numbers = #tpu.dot_dimension_numbers<[1], [0], [0], [1], [0, 0, 1, 1], [], []>} : vector<16x16xf32>, vector<16x32xf32>, vector<16x32xf32> -> vector<16x32xf32>
    %98 = arith.addf %95, %97 : vector<16x32xf32>
    %c0_48 = arith.constant 0 : index
    %c0_49 = arith.constant 0 : index
    %c0_50 = arith.constant 0 : index
    %99 = vector.load %arg2[%c0_48, %c0_49, %c0_50] : memref<1x16x16xf32, #tpu.memory_space<vmem>>, vector<1x16x16xf32>
    %100 = vector.shape_cast %99 : vector<1x16x16xf32> to vector<16x16xf32>
    %c0_51 = arith.constant 0 : index
    %c0_52 = arith.constant 0 : index
    %101 = vector.load %arg10[%c0_51, %c0_52] : memref<16x32xf32, #tpu.memory_space<vmem>>, vector<16x32xf32>
    %cst_53 = arith.constant dense<0.000000e+00> : vector<16x32xf32>
    %102 = tpu.matmul %100, %101, %cst_53 {dimension_numbers = #tpu.dot_dimension_numbers<[1], [0], [0], [1], [0, 0, 1, 1], [], []>} : vector<16x16xf32>, vector<16x32xf32>, vector<16x32xf32> -> vector<16x32xf32>
    %c0_54 = arith.constant 0 : index
    %c0_55 = arith.constant 0 : index
    %103 = vector.load %arg11[%c0_54, %c0_55] : memref<32x32xf32, #tpu.memory_space<vmem>>, vector<32x32xf32>
    %cst_56 = arith.constant dense<0.000000e+00> : vector<16x32xf32>
    %104 = tpu.matmul %98, %103, %cst_56 {dimension_numbers = #tpu.dot_dimension_numbers<[1], [0], [0], [1], [0, 0, 1, 1], [], []>} : vector<16x32xf32>, vector<32x32xf32>, vector<16x32xf32> -> vector<16x32xf32>
    %105 = arith.addf %102, %104 : vector<16x32xf32>
    %c0_57 = arith.constant 0 : index
    %c0_58 = arith.constant 0 : index
    %106 = vector.load %arg12[%c0_57, %c0_58] : memref<1x32xf32, #tpu.memory_space<vmem>>, vector<1x32xf32>
    %107 = vector.broadcast %106 : vector<1x32xf32> to vector<16x32xf32>
    %108 = arith.addf %105, %107 : vector<16x32xf32>
    %cst_59 = arith.constant 0.000000e+00 : f32
    %109 = vector.broadcast %cst_59 : f32 to vector<16x32xf32>
    %110 = arith.maximumf %108, %109 : vector<16x32xf32>
    %c0_60 = arith.constant 0 : index
    %c0_61 = arith.constant 0 : index
    %c0_62 = arith.constant 0 : index
    %111 = vector.load %arg7[%c0_60, %c0_61, %c0_62] : memref<1x8x16xf32, #tpu.memory_space<vmem>>, vector<1x8x16xf32>
    %112 = vector.shape_cast %111 : vector<1x8x16xf32> to vector<8x16xf32>
    %cst_63 = arith.constant dense<0.000000e+00> : vector<8x32xf32>
    %113 = tpu.matmul %112, %110, %cst_63 {dimension_numbers = #tpu.dot_dimension_numbers<[1], [0], [0], [1], [0, 0, 1, 1], [], []>} : vector<8x16xf32>, vector<16x32xf32>, vector<8x32xf32> -> vector<8x32xf32>
    %c0_64 = arith.constant 0 : index
    %c0_65 = arith.constant 0 : index
    %c0_66 = arith.constant 0 : index
    %114 = vector.load %arg13[%c0_64, %c0_65, %c0_66] : memref<1x8x32xf32, #tpu.memory_space<vmem>>, vector<1x8x32xf32>
    %115 = vector.shape_cast %114 : vector<1x8x32xf32> to vector<8x32xf32>
    %116 = vector.shape_cast %113 : vector<8x32xf32> to vector<1x8x32xf32>
    tpu.vector_store %arg13[%c0_64, %c0_65, %c0_66], %116 {strides = array<i32>} : memref<1x8x32xf32, #tpu.memory_space<vmem>>, vector<1x8x32xf32>,
    return
  }
  func.func @transform_0(%arg0: i32) -> (i32, i32, i32) {
    %c0_i32 = arith.constant 0 : i32
    %c0_i32_0 = arith.constant 0 : i32
    %c0_i32_1 = arith.constant 0 : i32
    return %arg0, %c0_i32, %c0_i32_0 : i32, i32, i32
  }
  func.func @transform_1(%arg0: i32) -> (i32, i32, i32) {
    %c0_i32 = arith.constant 0 : i32
    %c0_i32_0 = arith.constant 0 : i32
    %c0_i32_1 = arith.constant 0 : i32
    return %arg0, %c0_i32, %c0_i32_0 : i32, i32, i32
  }
  func.func @transform_2(%arg0: i32) -> (i32, i32, i32) {
    %c0_i32 = arith.constant 0 : i32
    %c0_i32_0 = arith.constant 0 : i32
    %c0_i32_1 = arith.constant 0 : i32
    return %arg0, %c0_i32, %c0_i32_0 : i32, i32, i32
  }
  func.func @transform_3(%arg0: i32) -> (i32, i32, i32) {
    %c0_i32 = arith.constant 0 : i32
    %c0_i32_0 = arith.constant 0 : i32
    %c0_i32_1 = arith.constant 0 : i32
    return %arg0, %c0_i32, %c0_i32_0 : i32, i32, i32
  }
  func.func @transform_4(%arg0: i32) -> (i32, i32, i32) {
    %c0_i32 = arith.constant 0 : i32
    %c0_i32_0 = arith.constant 0 : i32
    %c0_i32_1 = arith.constant 0 : i32
    return %arg0, %c0_i32, %c0_i32_0 : i32, i32, i32
  }
  func.func @transform_5(%arg0: i32) -> (i32, i32, i32) {
    %c0_i32 = arith.constant 0 : i32
    %c0_i32_0 = arith.constant 0 : i32
    %c0_i32_1 = arith.constant 0 : i32
    return %arg0, %c0_i32, %c0_i32_0 : i32, i32, i32
  }
  func.func @transform_6(%arg0: i32) -> (i32, i32, i32) {
    %c0_i32 = arith.constant 0 : i32
    %c0_i32_0 = arith.constant 0 : i32
    %c0_i32_1 = arith.constant 0 : i32
    return %arg0, %c0_i32, %c0_i32_0 : i32, i32, i32
  }
  func.func @transform_7(%arg0: i32) -> (i32, i32) {
    %c0_i32 = arith.constant 0 : i32
    %c0_i32_0 = arith.constant 0 : i32
    %c0_i32_1 = arith.constant 0 : i32
    return %c0_i32, %c0_i32_0 : i32, i32
  }
  func.func @transform_8(%arg0: i32) -> (i32, i32) {
    %c0_i32 = arith.constant 0 : i32
    %c0_i32_0 = arith.constant 0 : i32
    %c0_i32_1 = arith.constant 0 : i32
    return %c0_i32, %c0_i32_0 : i32, i32
  }
  func.func @transform_9(%arg0: i32) -> (i32, i32) {
    %c0_i32 = arith.constant 0 : i32
    %c0_i32_0 = arith.constant 0 : i32
    %c0_i32_1 = arith.constant 0 : i32
    return %c0_i32, %c0_i32_0 : i32, i32
  }
  func.func @transform_10(%arg0: i32) -> (i32, i32) {
    %c0_i32 = arith.constant 0 : i32
    %c0_i32_0 = arith.constant 0 : i32
    %c0_i32_1 = arith.constant 0 : i32
    return %c0_i32, %c0_i32_0 : i32, i32
  }
  func.func @transform_11(%arg0: i32) -> (i32, i32) {
    %c0_i32 = arith.constant 0 : i32
    %c0_i32_0 = arith.constant 0 : i32
    %c0_i32_1 = arith.constant 0 : i32
    return %c0_i32, %c0_i32_0 : i32, i32
  }
  func.func @transform_12(%arg0: i32) -> (i32, i32, i32) {
    %c0_i32 = arith.constant 0 : i32
    %c0_i32_0 = arith.constant 0 : i32
    %c0_i32_1 = arith.constant 0 : i32
    return %arg0, %c0_i32, %c0_i32_0 : i32, i32, i32
  }
}

</mosaic_0001>

<bundles_post_ra>
// kernel: tpu_custom_call.1
= control target key start
LH: loop header
LB: loop body
LE: loop exit
PB: predicated region body
PF: predicated region fallthrough
CT: control target
= control target key end

     0   :  { %s5862_s0 = inlined_call_operand.hbm [shape: f32[2,16,48], index: 0, kind: input, shape index: {}]   ;;  %s5863_s1 = inlined_call_operand.hbm [shape: f32[2,16,16], index: 1, kind: input, shape index: {}]   ;;  %s5864_s2 = inlined_call_operand.hbm [shape: bf16[2,16,16], index: 2, kind: input, shape index: {}]   ;;  %s5865_s3 = inlined_call_operand.hbm [shape: bf16[2,16,16], index: 3, kind: input, shape index: {}]   ;;  %s5866_s4 = inlined_call_operand.hbm [shape: bf16[2,16,16], index: 4, kind: input, shape index: {}]   ;;  %s5867_s5 = inlined_call_operand.hbm [shape: bf16[2,16,16], index: 5, kind: input, shape index: {}]   ;;  %s5868_s6 = inlined_call_operand.hbm [shape: f32[2,8,16], index: 6, kind: input, shape index: {}]   ;;  %s5869_s7 = inlined_call_operand.hbm [shape: f32[48,64], index: 7, kind: input, shape index: {}]   ;;  %s5870_s8 = inlined_call_operand.hbm [shape: f32[64,64], index: 8, kind: input, shape index: {}]   ;;  %s5871_s9 = inlined_call_operand.hbm [shape: f32[16,32], index: 9, kind: input, shape index: {}]   ;;  %s5872_s10 = inlined_call_operand.vmem [shape: f32[32,32], index: 10, kind: input, shape index: {}]   ;;  %s5873_s11 = inlined_call_operand.vmem [shape: f32[1,32], index: 11, kind: input, shape index: {}]   ;;  %s5874_s12 = inlined_call_operand.hbm [shape: f32[2,8,32], index: 12, kind: output, shape index: {}]  }
   0x1   :  { %5915 = sst [smem:[#allocation38_spill]] %s5863_s1 }
   0x2   :  { %5916 = sst [smem:[#allocation39_spill]] %s5865_s3 }
   0x3   :  { %5917 = sst [smem:[#allocation40_spill]] %s5867_s5 }
   0x4   :  { %5918 = sst [smem:[#allocation41_spill]] %s5868_s6 }
   0x5   :  { %5919 = sst [smem:[#allocation42_spill]] %s5869_s7 }
   0x6   :  { %5920 = sst [smem:[#allocation43_spill]] %s5872_s10 }
   0x7   :  { %5921 = sst [smem:[#allocation44_spill]] %s5873_s11 }
   0x8   :  { %5922 = sst [smem:[#allocation45_spill]] %s5874_s12 }
   0x9   :  { %17 = vsyncpa [#allocation3], 0 }
   0xa   :  { %19 = vsyncpa [#allocation3 + $0x1], 0 }
   0xb   :  { %20 = vsyncpa [#allocation6], 0 }
   0xc   :  { %22 = vsyncpa [#allocation6 + $0x1], 0 }
   0xd   :  { %23 = vsyncpa [#allocation9], 0 }
   0xe   :  { %25 = vsyncpa [#allocation9 + $0x1], 0 }
   0xf   :  { %26 = vsyncpa [#allocation12], 0 }
  0x10   :  { %28 = vsyncpa [#allocation12 + $0x1], 0 }
  0x11   :  { %29 = vsyncpa [#allocation15], 0 }
  0x12   :  { %30 = vsyncpa [#allocation18], 0 }
  0x13   :  { %31 = vsyncpa [#allocation4], 0 }
  0x14   :  { %33 = vsyncpa [#allocation4 + $0x1], 0  ;;  %s4879_s21 = smov 0   ;;  %s4881_s22 = smov 0  }
  0x15   :  { %s4883_s23 = smov 0   ;;  %s4885_s24 = smov 0  }
  0x16 LB: > { %5923 = sst [smem:[#allocation27_spill]] %s4781_s21  ;;  %s4900_s25 = sadd.s32 4294967295, %s4793_s24   ;;  %s4793_s24 = sphi %s4885_s24, %s6033_s24   ;;  %s4789_s23 = sphi %s4883_s23, %s6036_s23   ;;  %s4785_s22 = sphi %s4881_s22, %s6035_s22   ;;  %s4781_s21 = sphi %s4879_s21, %s6034_s21  }
  0x17   : > { %5924 = sst [smem:[#allocation28_spill]] %s4785_s22  ;;  %s3310_s26 = sadd.s32 4294967294, %s4793_s24  }
  0x18   : > { %5925 = sst [smem:[#allocation29_spill]] %s4789_s23  ;;  %s4904_s27 = sadd.s32 1, %s4793_s24  }
  0x19   : > { %5926 = sst [smem:[#allocation30_spill]] %s4900_s25  ;;  %s46_s28 = sadd.s32 1, %s4789_s23 }
  0x1a   : > { %5927 = sst [smem:[#allocation31_spill]] %s4904_s27  ;;  %s43_s29 = ssub.s32 %s4793_s24, %s4904_s27 }
  0x1b   : > { %p53_p0 = scmp.ne.s32.totalorder %s4789_s23, %s4785_s22  ;;  %p44_p1 = scmp.eq.s32.totalorder %s43_s29, 0 }
  0x1c   : > { %p54_p2 = scmp.eq.s32.totalorder %s4793_s24, 0  ;;  %p59_p3 = scmp.ne.s32.totalorder %s4785_s22, %s4781_s21 }
  0x1d   : > { %p5881_p4 = scmp.eq.s32.totalorder %s4900_s25, 0  ;;  %p344_p7 = scmp.eq.s32.totalorder %s4900_s25, 1 }
  0x1e   : > { %s4916_s30 = scalar_select %p44_p1, %s4789_s23, %s46_s28  }
  0x1f   : > { %p4918_p5 = por %p54_p2, %p53_p0  ;;  %p4924_p6 = por %p5881_p4, %p59_p3 }
  0x20   : > { %5928 = sst [smem:[#allocation32_spill]] %s4916_s30  ;;  %p350_p8 = scmp.eq.s32.totalorder %s3310_s26, 1 }
  0x21   : > { %s5929_s13 = scalar_select %p4918_p5, 1, 0 }
  0x22   : > { %s5930_s14 = scalar_select %p4924_p6, 1, 0 }
  0x23   : > { %p3311_p9 = scmp.ge.s32.totalorder %s4793_s24, 1  ;;  %p357_p10 = scmp.lt.s32.totalorder %s4793_s24, 3 }
  0x24   : > { %5931 = sst [smem:[#allocation33_spill]] %s5930_s14  ;;  %p4931_p11 = por %p344_p7, %p53_p0 }
  0x25   : > { %p4935_p12 = por %p350_p8, %p59_p3  ;;  %p4939_p13 = pnand %p3311_p9, %p357_p10 }
  0x26   : > { %s5932_s15 = scalar_select %p4931_p11, 1, 0 }
  0x27   : > { %s5934_s16 = scalar_select %p4935_p12, 1, 0 }
  0x28   : > { %5933 = sst [smem:[#allocation34_spill]] %s5932_s15  ;;  %p4326_p1 = pneg %p4939_p13 }
  0x29   : > { %5935 = sst [smem:[#allocation35_spill]] %s5934_s16  ;;  %s4795_s18 = smov [#allocation14]  }
  0x2a   : > { %s5936_s17 = scalar_select %p4939_p13, 1, 0 }
  0x2b   : > { %s369_s19 = sshll.u32 %s4795_s18, 4  ;;  %p4947_p2 = pnand %p4326_p1, %p5881_p4  ;;  %s370_s19 = int_to_ptr.vmem [resolvable:$true] %s369_s19 }
  0x2c   : > { %5937 = sst [smem:[#allocation36_spill]] %s5936_s17  ;;  %s4954_s26 = sand.u32 1, %s4789_s23  }
  0x2d   : > { %s5938_s20 = scalar_select %p4947_p2, 1, 0 }
  0x2e   : > { %s5939_s7 = sld [smem:[#allocation42_spill]]  ;;  %p4965_p8 = pneg %p4947_p2 }
  0x30   : > { %s5940_s18 = scalar_select %p4965_p8, 1, 0 }
  0x34   : > { %s4413_s27 = scalar_lea.hbm %s5939_s7, 768 }
  0x35   : > { %p4414_p7 = scmp.ne.s32.totalorder %s5939_s7, %s4413_s27  ;;  %p4420_p1 = scmp.lt.u32.totalorder %s4413_s27, %s5939_s7 }
  0x37   : > { %p4416_p9 = pnand %p4965_p8, %p4414_p7 }
  0x39   : > { %p4417_p10 = pneg %p4416_p9 }
  0x3b   : > { %p4422_p0 = pnand %p4420_p1, %p4417_p10 }
  0x3d   : > { %4425 = shalt.err (!%p4422_p0)
}
  0x3e   : > { %s4426_s30 = scalar_lea.vmem %s370_s19, 768  ;;  %p4434_p11 = scmp.lt.s32.totalorder %s370_s19, %s370_s19 }
  0x3f   : > { %p4427_p4 = scmp.ne.s32.totalorder %s370_s19, %s4426_s30  ;;  %p4435_p6 = scmp.lt.s32.totalorder %s4426_s30, %s4426_s30 }
  0x41   : > { %p4429_p3 = pnand %p4427_p4, %p4965_p8  ;;  %p4436_p13 = por %p4435_p6, %p4434_p11 }
  0x43   : > { %p4430_p12 = pneg %p4429_p3 }
  0x45   : > { %p4437_p5 = pnand %p4436_p13, %p4430_p12 }
  0x47   : > { %4440 = shalt.err (!%p4437_p5)
}
  0x48   : > { %s5888_s21 = smov 128   ;;  %s5891_s12 = smov 8  }
  0x49   : > { %4329 = dma.hbm_to_vmem [thread:$0]  (!%p4947_p2), %s5939_s7, 768, %s370_s19, [#allocation15], %s5888_s21, %s5888_s21, %s5891_s12  }
  0x4a   : > { %p5941_p4 = scmp.ne.s32.totalorder %s5929_s13, 0  ;;  %p5942_p5 = scmp.lt.s32.totalorder %s4793_s24, 2 }
  0x4b   : > { %s5890_s29 = sshll.u32 %s4793_s24, 8  ;;  %s4994_s30 = sand.u32 1, %s4793_s24  }
  0x4c   : > { %p4988_p6 = pnand %p5942_p5, %p5941_p4  ;;  %5944 = sst [smem:[#allocation37_spill]] %s4994_s30 }
  0x4d   : > { %s5945_s1 = sld [smem:[#allocation38_spill]]  ;;  %s5946_s10 = sshll.u32 %s4954_s26, 4 }
  0x4e   : > { %s5943_s16 = scalar_select %p4988_p6, 1, 0 }
  0x4f   : > { %s440_s13 = scalar_lea.vmem [#allocation5], %s5946_s10  ;;  %s5008_s23 = sshll.u32 %s4954_s26, 3 }
  0x50   : > { %s447_s19 = sshll.u32 %s440_s13, 4  ;;  %p5015_p12 = pneg %p4988_p6  ;;  %s5005_s19 = int_to_ptr.vmem [resolvable:$true] %s447_s19 }
  0x52   : > { %s5947_s15 = scalar_select %p5015_p12, 1, 0 }
  0x53   : > { %s5001_s11 = scalar_lea.hbm %s5945_s1, %s5890_s29  ;;  %s4446_s10 = scalar_lea.hbm %s5945_s1, 512 }
  0x54   : > { %s4441_s21 = scalar_lea.hbm %s5001_s11, 256  ;;  %p4447_p3 = scmp.lt.u32.totalorder %s5001_s11, %s5945_s1 }
  0x55   : > { %p4442_p11 = scmp.ne.s32.totalorder %s5001_s11, %s4441_s21  ;;  %p4448_p7 = scmp.lt.u32.totalorder %s4446_s10, %s4441_s21 }
  0x56   : > { %p4450_p10 = scmp.lt.u32.totalorder %s4441_s21, %s5001_s11 }
  0x57   : > { %p4444_p13 = pnand %p5015_p12, %p4442_p11  ;;  %p4449_p9 = por %p4448_p7, %p4447_p3 }
  0x59   : > { %p4445_p0 = pneg %p4444_p13  ;;  %p4451_p1 = por %p4450_p10, %p4449_p9 }
  0x5b   : > { %p4452_p4 = pnand %p4451_p1, %p4445_p0 }
  0x5d   : > { %4455 = shalt.err (!%p4452_p4)
}
  0x5e   : > { %s4456_s27 = scalar_lea.vmem %s5005_s19, 256  ;;  %s4798_s29 = smov [#allocation5]  }
  0x5f   : > { %p4457_p5 = scmp.ne.s32.totalorder %s5005_s19, %s4456_s27  ;;  %s4461_s28 = sshll.u32 %s4798_s29, 4  ;;  %s4462_s28 = int_to_ptr.vmem [resolvable:$false] %s4461_s28 }
  0x60   : > { %s4463_s12 = scalar_lea.vmem %s4462_s28, 512  ;;  %p4464_p2 = scmp.lt.s32.totalorder %s5005_s19, %s4462_s28 }
  0x61   : > { %p4459_p11 = pnand %p4457_p5, %p5015_p12  ;;  %p4465_p8 = scmp.lt.s32.totalorder %s4463_s12, %s4456_s27 }
  0x63   : > { %p4460_p13 = pneg %p4459_p11  ;;  %p4466_p3 = por %p4465_p8, %p4464_p2 }
  0x65   : > { %p4467_p7 = pnand %p4466_p3, %p4460_p13 }
  0x67   : > { %4470 = shalt.err (!%p4467_p7)
}
  0x68   : > { %s5948_s21 = smov 8   ;;  %s5949_s10 = smov 128  }
  0x69   : > { %s5950_s13 = scalar_lea.sflag [#allocation6], %s4994_s30  ;;  %s5044_s29 = sshll.u32 %s4793_s24, 7 }
  0x6a   : > { %4342 = dma.hbm_to_vmem [thread:$0]  (!%p4988_p6), %s5001_s11, 256, %s5005_s19, %s5950_s13, %s5949_s10, %s5949_s10, %s5948_s21  }
  0x6b   : > { %s5951_s3 = sld [smem:[#allocation39_spill]]  ;;  %s482_s1 = scalar_lea.vmem [#allocation8], %s5008_s23 }
  0x6c   : > { %s489_s7 = sshll.u32 %s482_s1, 4  ;;  %s5902_s25 = scalar_lea.sflag [#allocation9], %s4994_s30  ;;  %s5053_s7 = int_to_ptr.vmem [resolvable:$true] %s489_s7 }
  0x71   : > { %s5050_s12 = scalar_lea.hbm %s5951_s3, %s5044_s29  ;;  %s4476_s13 = scalar_lea.hbm %s5951_s3, 256 }
  0x72   : > { %s4471_s14 = scalar_lea.hbm %s5050_s12, 128  ;;  %p4477_p9 = scmp.lt.u32.totalorder %s5050_s12, %s5951_s3 }
  0x73   : > { %p4472_p2 = scmp.ne.s32.totalorder %s5050_s12, %s4471_s14  ;;  %p4478_p10 = scmp.lt.u32.totalorder %s4476_s13, %s4471_s14 }
  0x74   : > { %p4480_p4 = scmp.lt.u32.totalorder %s4471_s14, %s5050_s12 }
  0x75   : > { %p4474_p8 = pnand %p4472_p2, %p5015_p12  ;;  %p4479_p1 = por %p4478_p10, %p4477_p9 }
  0x77   : > { %p4475_p0 = pneg %p4474_p8  ;;  %p4481_p5 = por %p4480_p4, %p4479_p1 }
  0x79   : > { %p4482_p11 = pnand %p4481_p5, %p4475_p0 }
  0x7b   : > { %4485 = shalt.err (!%p4482_p11)
}
  0x7c   : > { %s4486_s1 = scalar_lea.vmem %s5053_s7, 128  ;;  %s4799_s11 = smov [#allocation8]  }
  0x7d   : > { %p4487_p13 = scmp.ne.s32.totalorder %s5053_s7, %s4486_s1  ;;  %s4491_s19 = sshll.u32 %s4799_s11, 4  ;;  %s4492_s19 = int_to_ptr.vmem [resolvable:$false] %s4491_s19 }
  0x7e   : > { %s4493_s27 = scalar_lea.vmem %s4492_s19, 256  ;;  %p4494_p2 = scmp.lt.s32.totalorder %s5053_s7, %s4492_s19 }
  0x7f   : > { %p4489_p3 = pnand %p4487_p13, %p5015_p12  ;;  %p4495_p8 = scmp.lt.s32.totalorder %s4493_s27, %s4486_s1 }
  0x81   : > { %p4490_p7 = pneg %p4489_p3  ;;  %p4496_p9 = por %p4495_p8, %p4494_p2 }
  0x83   : > { %p4497_p10 = pnand %p4496_p9, %p4490_p7 }
  0x85   : > { %4500 = shalt.err (!%p4497_p10)
}
  0x86   : > { %s4800_s14 = smov 64   ;;  %s4801_s13 = smov 4  }
  0x87   : > { %4348 = dma.hbm_to_vmem [thread:$0]  (!%p4988_p6), %s5050_s12, 128, %s5053_s7, %s5902_s25, %s4800_s14, %s4800_s14, %s4801_s13  }
  0x88   : > { %s5952_s5 = sld [smem:[#allocation40_spill]]  ;;  %s524_s19 = scalar_lea.vmem [#allocation11], %s5008_s23 }
  0x89   : > { %s531_s27 = sshll.u32 %s524_s19, 4  ;;  %s521_s3 = scalar_lea.sflag [#allocation12], %s4994_s30  ;;  %s5089_s27 = int_to_ptr.vmem [resolvable:$true] %s531_s27 }
  0x8e   : > { %s5086_s11 = scalar_lea.hbm %s5952_s5, %s5044_s29  ;;  %s4506_s28 = scalar_lea.hbm %s5952_s5, 256 }
  0x8f   : > { %s4501_s22 = scalar_lea.hbm %s5086_s11, 128  ;;  %p4507_p5 = scmp.lt.u32.totalorder %s5086_s11, %s5952_s5 }
  0x90   : > { %p4502_p0 = scmp.ne.s32.totalorder %s5086_s11, %s4501_s22  ;;  %p4508_p11 = scmp.lt.u32.totalorder %s4506_s28, %s4501_s22 }
  0x91   : > { %p4510_p3 = scmp.lt.u32.totalorder %s4501_s22, %s5086_s11 }
  0x92   : > { %p4504_p1 = pnand %p4502_p0, %p5015_p12  ;;  %p4509_p13 = por %p4508_p11, %p4507_p5 }
  0x94   : > { %p4505_p4 = pneg %p4504_p1  ;;  %p4511_p7 = por %p4510_p3, %p4509_p13 }
  0x96   : > { %p4512_p2 = pnand %p4511_p7, %p4505_p4 }
  0x98   : > { %4515 = shalt.err (!%p4512_p2)
}
  0x99   : > { %s4516_s19 = scalar_lea.vmem %s5089_s27, 128  ;;  %s4802_s7 = smov [#allocation11]  }
  0x9a   : > { %p4517_p8 = scmp.ne.s32.totalorder %s5089_s27, %s4516_s19  ;;  %s4521_s12 = sshll.u32 %s4802_s7, 4  ;;  %s4522_s12 = int_to_ptr.vmem [resolvable:$false] %s4521_s12 }
  0x9b   : > { %s4523_s25 = scalar_lea.vmem %s4522_s12, 256  ;;  %p4524_p0 = scmp.lt.s32.totalorder %s5089_s27, %s4522_s12 }
  0x9c   : > { %p4519_p9 = pnand %p4517_p8, %p5015_p12  ;;  %p4525_p1 = scmp.lt.s32.totalorder %s4523_s25, %s4516_s19 }
  0x9e   : > { %p4520_p10 = pneg %p4519_p9  ;;  %p4526_p5 = por %p4525_p1, %p4524_p0 }
  0xa0   : > { %p4527_p11 = pnand %p4526_p5, %p4520_p10 }
  0xa2   : > { %4530 = shalt.err (!%p4527_p11)
}
  0xa3   : > { %4354 = dma.hbm_to_vmem [thread:$0]  (!%p4988_p6), %s5086_s11, 128, %s5089_s27, %s521_s3, %s4800_s14, %s4800_s14, %s4801_s13  }
  0xa4   : > { %s4803_s22 = smov [#allocation16]   ;;  %s4804_s1 = smov [#allocation17]  }
  0xa5   : > { %s382_s28 = sshll.u32 %s4803_s22, 4  ;;  %s395_s7 = sshll.u32 %s4804_s1, 4  ;;  %s383_s28 = int_to_ptr.vmem [resolvable:$true] %s382_s28  ;;  %s396_s7 = int_to_ptr.vmem [resolvable:$true] %s395_s7 }
  0xa6   : > { %s4531_s25 = scalar_lea.hbm %s5870_s8, 1024  ;;  %p5953_p13 = scmp.ne.s32.totalorder %s5940_s18, 0 }
  0xa7   : > { %p4532_p4 = scmp.ne.s32.totalorder %s5870_s8, %s4531_s25  ;;  %p4538_p2 = scmp.lt.u32.totalorder %s4531_s25, %s5870_s8 }
  0xa9   : > { %p4534_p3 = pnand %p4532_p4, %p5953_p13 }
  0xab   : > { %p4535_p7 = pneg %p4534_p3 }
  0xad   : > { %p4540_p8 = pnand %p4538_p2, %p4535_p7 }
  0xaf   : > { %4543 = shalt.err (!%p4540_p8)
}
  0xb0   : > { %s4544_s11 = scalar_lea.vmem %s383_s28, 1024  ;;  %p4552_p1 = scmp.lt.s32.totalorder %s383_s28, %s383_s28 }
  0xb1   : > { %p4545_p9 = scmp.ne.s32.totalorder %s383_s28, %s4544_s11  ;;  %p4553_p5 = scmp.lt.s32.totalorder %s4544_s11, %s4544_s11 }
  0xb3   : > { %p4547_p10 = pnand %p4545_p9, %p5953_p13  ;;  %p4554_p11 = por %p4553_p5, %p4552_p1 }
  0xb5   : > { %p4548_p0 = pneg %p4547_p10 }
  0xb7   : > { %p4555_p6 = pnand %p4554_p11, %p4548_p0 }
  0xb9   : > { %4558 = shalt.err (!%p4555_p6)
}
  0xba   : > { %p5954_p4 = scmp.ne.s32.totalorder %s5938_s20, 0  ;;  %s4559_s27 = scalar_lea.hbm %s5871_s9, 256 }
  0xbb   : > { %p4560_p3 = scmp.ne.s32.totalorder %s5871_s9, %s4559_s27  ;;  %p4566_p2 = scmp.lt.u32.totalorder %s4559_s27, %s5871_s9 }
  0xbc   : > { %4332 = dma.hbm_to_vmem [thread:$0]  (!%p5954_p4), %s5870_s8, 1024, %s383_s28, [#allocation15], %s5949_s10, %s5949_s10, %s5948_s21  }
  0xbd   : > { %p4562_p6 = pnand %p4560_p3, %p5953_p13 }
  0xbf   : > { %p4563_p7 = pneg %p4562_p6 }
  0xc1   : > { %p4568_p8 = pnand %p4566_p2, %p4563_p7 }
  0xc3   : > { %4571 = shalt.err (!%p4568_p8)
}
  0xc4   : > { %s4572_s25 = scalar_lea.vmem %s396_s7, 256  ;;  %p4580_p1 = scmp.lt.s32.totalorder %s396_s7, %s396_s7 }
  0xc5   : > { %p4573_p9 = scmp.ne.s32.totalorder %s396_s7, %s4572_s25  ;;  %p4581_p5 = scmp.lt.s32.totalorder %s4572_s25, %s4572_s25 }
  0xc7   : > { %p4575_p10 = pnand %p4573_p9, %p5953_p13  ;;  %p4582_p11 = por %p4581_p5, %p4580_p1 }
  0xc9   : > { %p4576_p0 = pneg %p4575_p10 }
  0xcb   : > { %p4583_p12 = pnand %p4582_p11, %p4576_p0 }
  0xcd   : > { %4586 = shalt.err (!%p4583_p12)
}
  0xce   : > { %4335 = dma.hbm_to_vmem [thread:$0]  (!%p5954_p4), %s5871_s9, 256, %s396_s7, [#allocation18], %s5949_s10, %s5949_s10, %s5948_s21  }
  0xcf   : > { %s5955_s18 = sshll.u32 %s4793_s24, 8  ;;  %s5956_s30 = sshll.u32 %s4954_s26, 4 }
  0xd0   : > { %s5165_s17 = scalar_lea.hbm %s5862_s0, %s5955_s18  ;;  %s419_s20 = scalar_lea.vmem [#allocation2], %s5956_s30 }
  0xd1   : > { %s426_s27 = sshll.u32 %s419_s20, 4  ;;  %s5175_s19 = scalar_lea.hbm %s5864_s2, %s5044_s29  ;;  %s5169_s27 = int_to_ptr.vmem [resolvable:$true] %s426_s27 }
  0xd2   : > { %s416_s7 = scalar_lea.sflag [#allocation3], %s4954_s26  ;;  %s4587_s12 = scalar_lea.hbm %s5165_s17, 256 }
  0xd3   : > { %p4588_p12 = scmp.ne.s32.totalorder %s5165_s17, %s4587_s12  ;;  %p5957_p13 = scmp.ne.s32.totalorder %s5947_s15, 0 }
  0xd4   : > { %s4592_s11 = scalar_lea.hbm %s5862_s0, 512  ;;  %p4593_p6 = scmp.lt.u32.totalorder %s5165_s17, %s5862_s0 }
  0xd5   : > { %p4590_p4 = pnand %p4588_p12, %p5957_p13  ;;  %p4594_p7 = scmp.lt.u32.totalorder %s4592_s11, %s4587_s12 }
  0xd6   : > { %p4596_p8 = scmp.lt.u32.totalorder %s4587_s12, %s5165_s17 }
  0xd7   : > { %p4591_p3 = pneg %p4590_p4  ;;  %p4595_p2 = por %p4594_p7, %p4593_p6 }
  0xd9   : > { %p4597_p9 = por %p4596_p8, %p4595_p2 }
  0xdb   : > { %p4598_p10 = pnand %p4597_p9, %p4591_p3 }
  0xdd   : > { %4601 = shalt.err (!%p4598_p10)
}
  0xde   : > { %s4602_s6 = scalar_lea.vmem %s5169_s27, 256  ;;  %s4805_s30 = smov [#allocation2]  }
  0xdf   : > { %p4603_p0 = scmp.ne.s32.totalorder %s5169_s27, %s4602_s6  ;;  %s4607_s20 = sshll.u32 %s4805_s30, 4  ;;  %s4608_s20 = int_to_ptr.vmem [resolvable:$false] %s4607_s20 }
  0xe0   : > { %s4609_s22 = scalar_lea.vmem %s4608_s20, 512  ;;  %p4610_p11 = scmp.lt.s32.totalorder %s5169_s27, %s4608_s20 }
  0xe1   : > { %p4605_p1 = pnand %p4603_p0, %p5957_p13  ;;  %p4611_p12 = scmp.lt.s32.totalorder %s4609_s22, %s4602_s6 }
  0xe3   : > { %p4606_p5 = pneg %p4605_p1  ;;  %p4612_p4 = por %p4611_p12, %p4610_p11 }
  0xe5   : > { %p4613_p6 = pnand %p4612_p4, %p4606_p5 }
  0xe7   : > { %4616 = shalt.err (!%p4613_p6)
}
  0xe8   : > { %p5958_p3 = scmp.ne.s32.totalorder %s5943_s16, 0  ;;  %s461_s1 = scalar_lea.vmem [#allocation7], %s5008_s23 }
  0xe9   : > { %s468_s12 = sshll.u32 %s461_s1, 4  ;;  %s5211_s11 = scalar_lea.hbm %s5866_s4, %s5044_s29  ;;  %s5205_s12 = int_to_ptr.vmem [resolvable:$true] %s468_s12 }
  0xea   : > { %4339 = dma.hbm_to_vmem [thread:$0]  (!%p5958_p3), %s5165_s17, 256, %s5169_s27, %s416_s7, %s5949_s10, %s5949_s10, %s5948_s21  }
  0xeb   : > { %s4617_s26 = scalar_lea.hbm %s5175_s19, 128  ;;  %s4622_s6 = scalar_lea.hbm %s5864_s2, 256 }
  0xec   : > { %p4618_p7 = scmp.ne.s32.totalorder %s5175_s19, %s4617_s26  ;;  %p4623_p9 = scmp.lt.u32.totalorder %s5175_s19, %s5864_s2 }
  0xed   : > { %p4624_p10 = scmp.lt.u32.totalorder %s4622_s6, %s4617_s26  ;;  %p4626_p1 = scmp.lt.u32.totalorder %s4617_s26, %s5175_s19 }
  0xee   : > { %p4620_p2 = pnand %p4618_p7, %p5957_p13 }
  0xef   : > { %p4625_p0 = por %p4624_p10, %p4623_p9 }
  0xf0   : > { %p4621_p8 = pneg %p4620_p2 }
  0xf1   : > { %p4627_p5 = por %p4626_p1, %p4625_p0 }
  0xf3   : > { %p4628_p11 = pnand %p4627_p5, %p4621_p8 }
  0xf5   : > { %4631 = shalt.err (!%p4628_p11)
}
  0xf6   : > { %s4632_s10 = scalar_lea.vmem %s5205_s12, 128  ;;  %s4806_s17 = smov [#allocation7]  }
  0xf7   : > { %p4633_p12 = scmp.ne.s32.totalorder %s5205_s12, %s4632_s10  ;;  %s4637_s27 = sshll.u32 %s4806_s17, 4  ;;  %s4638_s27 = int_to_ptr.vmem [resolvable:$false] %s4637_s27 }
  0xf8   : > { %s4639_s7 = scalar_lea.vmem %s4638_s27, 256  ;;  %p4640_p7 = scmp.lt.s32.totalorder %s5205_s12, %s4638_s27 }
  0xf9   : > { %p4635_p4 = pnand %p4633_p12, %p5957_p13  ;;  %p4641_p2 = scmp.lt.s32.totalorder %s4639_s7, %s4632_s10 }
  0xfb   : > { %p4636_p6 = pneg %p4635_p4  ;;  %p4642_p9 = por %p4641_p2, %p4640_p7 }
  0xfd   : > { %p4643_p10 = pnand %p4642_p9, %p4636_p6 }
  0xff   : > { %4646 = shalt.err (!%p4643_p10)
}
 0x100   : > { %s5959_s20 = sld [smem:[#allocation37_spill]]  ;;  %s503_s1 = scalar_lea.vmem [#allocation10], %s5008_s23 }
 0x101   : > { %s510_s25 = sshll.u32 %s503_s1, 4  ;;  %s5961_s18 = sld [smem:[#allocation41_spill]]  ;;  %s5240_s25 = int_to_ptr.vmem [resolvable:$true] %s510_s25 }
 0x102   : > { %s4647_s6 = scalar_lea.hbm %s5211_s11, 128  ;;  %s4652_s10 = scalar_lea.hbm %s5866_s4, 256 }
 0x103   : > { %p4648_p8 = scmp.ne.s32.totalorder %s5211_s11, %s4647_s6  ;;  %p4653_p5 = scmp.lt.u32.totalorder %s5211_s11, %s5866_s4 }
 0x104   : > { %p4654_p11 = scmp.lt.u32.totalorder %s4652_s10, %s4647_s6  ;;  %p4656_p4 = scmp.lt.u32.totalorder %s4647_s6, %s5211_s11 }
 0x105   : > { %p4650_p0 = pnand %p4648_p8, %p5957_p13 }
 0x106   : > { %s5960_s22 = scalar_lea.sflag [#allocation6], %s5959_s20  ;;  %p4655_p12 = por %p4654_p11, %p4653_p5 }
 0x107   : > { %4345 = dma.hbm_to_vmem [thread:$0]  (!%p5958_p3), %s5175_s19, 128, %s5205_s12, %s5960_s22, %s4800_s14, %s4800_s14, %s4801_s13  }
 0x108   : > { %s5246_s5 = scalar_lea.hbm %s5961_s18, %s5044_s29  ;;  %p4651_p1 = pneg %p4650_p0 }
 0x109   : > { %p4657_p6 = por %p4656_p4, %p4655_p12 }
 0x10b   : > { %p4658_p7 = pnand %p4657_p6, %p4651_p1 }
 0x10d   : > { %4661 = shalt.err (!%p4658_p7)
}
 0x10e   : > { %s4662_s29 = scalar_lea.vmem %s5240_s25, 128  ;;  %s4807_s12 = smov [#allocation10]  }
 0x10f   : > { %p4663_p2 = scmp.ne.s32.totalorder %s5240_s25, %s4662_s29  ;;  %s4667_s27 = sshll.u32 %s4807_s12, 4  ;;  %s4668_s27 = int_to_ptr.vmem [resolvable:$false] %s4667_s27 }
 0x110   : > { %s4669_s7 = scalar_lea.vmem %s4668_s27, 256  ;;  %p4670_p8 = scmp.lt.s32.totalorder %s5240_s25, %s4668_s27 }
 0x111   : > { %p4665_p9 = pnand %p4663_p2, %p5957_p13  ;;  %p4671_p0 = scmp.lt.s32.totalorder %s4669_s7, %s4662_s29 }
 0x113   : > { %p4666_p10 = pneg %p4665_p9  ;;  %p4672_p5 = por %p4671_p0, %p4670_p8 }
 0x115   : > { %p4673_p11 = pnand %p4672_p5, %p4666_p10 }
 0x117   : > { %4676 = shalt.err (!%p4673_p11)
}
 0x118   : > { %s5962_s22 = scalar_lea.sflag [#allocation9], %s5959_s20  ;;  %s545_s1 = scalar_lea.vmem [#allocation13], %s5008_s23 }
 0x119   : > { %4351 = dma.hbm_to_vmem [thread:$0]  (!%p5958_p3), %s5211_s11, 128, %s5240_s25, %s5962_s22, %s4800_s14, %s4800_s14, %s4801_s13  }
 0x11a   : > { %s552_s28 = sshll.u32 %s545_s1, 4  ;;  %s4677_s26 = scalar_lea.hbm %s5246_s5, 128  ;;  %s553_s28 = int_to_ptr.vmem [resolvable:$true] %s552_s28 }
 0x11b   : > { %p4678_p1 = scmp.ne.s32.totalorder %s5246_s5, %s4677_s26  ;;  %s4682_s21 = scalar_lea.hbm %s5961_s18, 256 }
 0x11c   : > { %p4683_p6 = scmp.lt.u32.totalorder %s5246_s5, %s5961_s18  ;;  %p4684_p7 = scmp.lt.u32.totalorder %s4682_s21, %s4677_s26 }
 0x11d   : > { %p4680_p12 = pnand %p4678_p1, %p5957_p13  ;;  %p4686_p9 = scmp.lt.u32.totalorder %s4677_s26, %s5246_s5 }
 0x11e   : > { %p4685_p2 = por %p4684_p7, %p4683_p6 }
 0x11f   : > { %p4681_p4 = pneg %p4680_p12 }
 0x120   : > { %p4687_p10 = por %p4686_p9, %p4685_p2 }
 0x122   : > { %p4688_p8 = pnand %p4687_p10, %p4681_p4 }
 0x124   : > { %4691 = shalt.err (!%p4688_p8)
}
 0x125   : > { %s4692_s23 = scalar_lea.vmem %s553_s28, 128  ;;  %s4808_s14 = smov [#allocation13]  }
 0x126   : > { %p4693_p0 = scmp.ne.s32.totalorder %s553_s28, %s4692_s23  ;;  %s4697_s13 = sshll.u32 %s4808_s14, 4  ;;  %s4698_s13 = int_to_ptr.vmem [resolvable:$false] %s4697_s13 }
 0x127   : > { %s4699_s11 = scalar_lea.vmem %s4698_s13, 256  ;;  %p4700_p1 = scmp.lt.s32.totalorder %s553_s28, %s4698_s13 }
 0x128   : > { %p4695_p5 = pnand %p4693_p0, %p5957_p13  ;;  %p4701_p12 = scmp.lt.s32.totalorder %s4699_s11, %s4692_s23 }
 0x12a   : > { %p4696_p11 = pneg %p4695_p5  ;;  %p4702_p3 = por %p4701_p12, %p4700_p1 }
 0x12c   : > { %p4703_p6 = pnand %p4702_p3, %p4696_p11 }
 0x12e   : > { %4706 = shalt.err (!%p4703_p6)
}
 0x12f   : > { %p5963_p7 = scmp.ne.s32.totalorder %s5943_s16, 0  ;;  %s5964_s25 = sld [smem:[#allocation36_spill]] }
 0x131   : > { %4357 = dma.hbm_to_vmem [thread:$0]  (!%p5963_p7), %s5246_s5, 128, %s553_s28, %s521_s3  }
 0x135   : > { %p5965_p4 = scmp.ne.s32.totalorder %s5964_s25, 0 }
 0x136   : > { %s5966_s15 = sld [smem:[#allocation28_spill]] (!%p5965_p4)  ;;  %s5967_s19 = sld [smem:[#allocation33_spill]] (!%p5965_p4) }
 0x137   : > { %561 = sbr.rel (%p5965_p4) target bundleno = 3678 (0xe5e), region = 68 }
 0x13c   : > { %s5297_s29 = sand.u32 (!%p5965_p4), 1, %s5966_s15   ;;  %p5968_p13 = scmp.ne.s32.totalorder (!%p5965_p4), %s5967_s19, 0 }
 0x13d   : > { %s3337_s12 = sshll.u32 (!%p5965_p4), %s5297_s29, 4  ;;  %s564_s27 = scalar_lea.sflag (!%p5965_p4), [#allocation3], %s5297_s29 }
 0x13e   : > { %s5301_s7 = scalar_lea.vmem [#allocation2], %s3337_s12 }
 0x13f   : > { %4752 = dma.done.wait (%p5968_p13), %s564_s27, 256  }
 0x140   : > { %4754 = vsyncadd (%p5968_p13), %s564_s27, 4294967040  ;;  %s5969_s16 = sld [smem:[#allocation30_spill]]  ;;  %s5308_s5 = scalar_lea.vmem [#allocation5], %s3337_s12 }
 0x146   : > { %s572_s3 = sand.u32 1, %s5969_s16  }
 0x147   : > { %s573_s20 = scalar_lea.sflag [#allocation6], %s572_s3 }
 0x148   : > { %4756 = dma.done.wait (%p5968_p13), %s573_s20, 384  }
 0x149   : > { %4758 = vsyncadd (%p5968_p13), %s573_s20, 4294966912  ;;  %s5315_s22 = sshll.u32 %s5297_s29, 3  ;;  %s591_s28 = scalar_lea.sflag [#allocation9], %s572_s3 }
 0x14a   : > { %s585_s1 = scalar_lea.vmem [#allocation7], %s5315_s22  ;;  %s594_s26 = scalar_lea.vmem [#allocation8], %s5315_s22 }
 0x14b   : > { %4760 = dma.done.wait (%p5968_p13), %s591_s28, 256  }
 0x14c   : > { %4762 = vsyncadd (%p5968_p13), %s591_s28, 4294967040  ;;  %s603_s6 = scalar_lea.vmem [#allocation10], %s5315_s22  ;;  %s609_s30 = scalar_lea.sflag [#allocation12], %s572_s3 }
 0x14d   : > { %s612_s21 = scalar_lea.vmem [#allocation11], %s5315_s22 }
 0x14e   : > { %4764 = dma.done.wait (%p5968_p13), %s609_s30, 256  }
 0x14f   : > { %4766 = vsyncadd (%p5968_p13), %s609_s30, 4294967040  ;;  %s621_s10 = scalar_lea.vmem [#allocation13], %s5315_s22  ;;  %p5970_p3 = scmp.eq.s32.totalorder %s5969_s16, 0 }
 0x151   : > { %4768 = dma.done.wait (%p5970_p3), [#allocation15], 1792   ;;  %p5971_p2 = pmov %p5970_p3 }
 0x153   : > { %4770 = vsyncadd (%p5971_p2), [#allocation15], 4294965504  ;;  %p5972_p9 = pmov %p5971_p2 }
 0x154   : > { %p5973_p10 = pmov %p5971_p2 }
 0x155   : > { %4772 = dma.done.wait (%p5972_p9), [#allocation18], 256  }
 0x156   : > { %4774 = vsyncadd (%p5973_p10), [#allocation18], 4294967040  ;;  %v704_v0 = vlaneseq  ;;  %v829_v12 = vld [vmem:[#allocation14] sm:$0xff]  ;;  %v830_v13 = vld [vmem:[#allocation14 + $0x8] sm:$0xff]  ;;  %vm835_vm1 = vcmask 392192   ;;  %v4810_v29 = vmov 0.0|0.0  }
 0x157   : > { %v831_v14 = vld [vmem:[#allocation14 + $0x10] sm:$0xff]  ;;  %v4039_v17 = vpack.c.bf16 %v830_v13, %v829_v12  ;;  %v832_v18 = vld [vmem:[#allocation14 + $0x18] sm:$0xff]  ;;  %v833_v19 = vld [vmem:[#allocation14 + $0x20] sm:$0xff]  ;;  %v4809_v25 = vmov 1.0|1.0   ;;  %v4811_v62 = vmov 0.0  }
 0x158   : > { %v705_v1 = vshrl.u32 %v704_v0, 7  ;;  %v714_v2 = vand.u32 127, %v704_v0  ;;  %v4043_v20 = vpack.c.bf16 %v832_v18, %v831_v14  ;;  %v834_v21 = vld [vmem:[#allocation14 + $0x28] sm:$0xff]  ;;  %v827_v22 = vld [vmem:[%s5301_s7] sm:$0xff]  ;;  %s6018_s14 = sld [smem:[#allocation43_spill]]  ;;  %s6024_s3 = sld [smem:[#allocation44_spill]] }
 0x159   : > { %4040 = vmatprep.subr.bf16.mxu0 %v4039_v17  ;;  %3707 = vmatprep.mubr.msk.f32.mxu0 %vm835_vm1, %v827_v22  ;;  %v4047_v26 = vpack.c.bf16 %v834_v21, %v833_v19  ;;  %v828_v28 = vld [vmem:[%s5301_s7 + $0x8] sm:$0xff]  ;;  %v3503_v41 = vld [vmem:[%s603_s6] sm:$0xff]   ;;  %v821_v22 = vld [vmem:[#allocation16 + $0x10] sm:$0xff]  ;;  %s6025_s20 = sld [smem:[#allocation34_spill]] }
 0x15a   : > { %v706_v3 = vadd.s32 8, %v705_v1  ;;  %v5338_v4 = vsub.s32 %v714_v2, %v705_v1  ;;  %v707_v5 = vadd.s32 16, %v705_v1  ;;  %v708_v6 = vadd.s32 24, %v705_v1  ;;  %4042 = vmatpush3.bf16.msra.mxu0 %v4039_v17  ;;  %v3507_v49 = vld [vmem:[%s612_s21] sm:$0xff]   ;;  %v5492_v55 = vld [vmem:[%s585_s1] sm:$0xff]   ;;  %s703_s1 = scalar_lea.vmem [#allocation19], %s5315_s22 }
 0x15b   : > { %v709_v7 = vadd.s32 32, %v705_v1  ;;  %v710_v8 = vadd.s32 40, %v705_v1  ;;  %4044 = vmatprep.subr.bf16.mxu0 %v4043_v20  ;;  %v711_v31 = vadd.s32 48, %v705_v1  ;;  %v712_v32 = vadd.s32 56, %v705_v1  ;;  %v5484_v53 = vld [vmem:[%s594_s26] sm:$0xff]   ;;  %v819_v19 = vld [vmem:[#allocation16] sm:$0xff] }
 0x15c   : > { %v5340_v9 = vsub.s32 %v714_v2, %v706_v3  ;;  %vm723_vm0 = vcmp.eq.s32.totalorder %v5338_v4, 0  ;;  %v5343_v10 = vsub.s32 %v714_v2, %v707_v5  ;;  %v5345_v11 = vsub.s32 %v714_v2, %v708_v6  ;;  %s3082_s28 = sshll.u32 %s703_s1, 4  ;;  %s6027_s30 = sld [smem:[#allocation45_spill]]  ;;  %s5819_s28 = int_to_ptr.vmem [resolvable:$true] %s3082_s28 }
 0x15d   : > { %v5347_v15 = vsub.s32 %v714_v2, %v709_v7  ;;  %v5349_v16 = vsub.s32 %v714_v2, %v710_v8  ;;  %v5412_v33 = vsub.s32 %v714_v2, %v711_v31  ;;  %v5414_v34 = vsub.s32 %v714_v2, %v712_v32  ;;  %v823_v31 = vld [vmem:[#allocation16 + $0x20] sm:$0xff]  ;;  %v824_v32 = vld [vmem:[#allocation16 + $0x28] sm:$0xff]  ;;  %s4707_s17 = scalar_lea.vmem %s5819_s28, 128 }
 0x15e   : > { %vm724_vm2 = vcmp.eq.s32.totalorder %v5340_v9, 0  ;;  %vm725_vm3 = vcmp.eq.s32.totalorder %v5343_v10, 0  ;;  %vm726_vm4 = vcmp.eq.s32.totalorder %v5345_v11, 0  ;;  %4046 = vmatpush3.bf16.msra.mxu0 %v4043_v20  ;;  %v5464_v42 = vunpack.c.l.bf16 %v3503_v41  ;;  %v820_v20 = vld [vmem:[#allocation16 + $0x8] sm:$0xff]  ;;  %p4708_p8 = scmp.ne.s32.totalorder %s5819_s28, %s4707_s17 }
 0x15f   : > { %vm5357_vm5 = vmpackc.low %vm724_vm2, %vm723_vm0  ;;  %vm727_vm7 = vcmp.eq.s32.totalorder %v5347_v15, 0  ;;  %vm728_vm8 = vcmp.eq.s32.totalorder %v5349_v16, 0  ;;  %4048 = vmatprep.subr.bf16.mxu0 %v4047_v26  ;;  %vm751_vm10 = vcmp.eq.s32.totalorder %v5347_v15, 4294967264  ;;  %vm752_vm11 = vcmp.eq.s32.totalorder %v5349_v16, 4294967264  ;;  %p6028_p0 = scmp.ne.s32.totalorder %s6025_s20, 0 }
 0x160   : > { %vm5362_vm6 = vmpackc.low %vm726_vm4, %vm725_vm3  ;;  %4052 = vmatprep.subr.msk.bf16.mxu1 %vm5357_vm5, %v4809_v25  ;;  %vm729_vm13 = vcmp.eq.s32.totalorder %v5412_v33, 0  ;;  %vm730_vm14 = vcmp.eq.s32.totalorder %v5414_v34, 0  ;;  %vm753_vm15 = vcmp.eq.s32.totalorder %v5412_v33, 4294967264  ;;  %vm5913_vm0 = vcmp.eq.s32.totalorder %v5414_v34, 4294967264 }
 0x161   : > { %4054 = vmatpush3.bf16.msk.msra.mxu1 %vm5357_vm5, %v4809_v25  ;;  %vm5377_vm9 = vmpackc.low %vm728_vm8, %vm727_vm7  ;;  %vm5912_vm3 = vcmask 523264   ;;  %vm5914_vm4 = vcmask 130048   ;;  %v5470_v50 = vunpack.c.h.bf16 %v3503_v41  ;;  %v5472_v51 = vunpack.c.l.bf16 %v3507_v49  ;;  %v826_v41 = vld [vmem:[#allocation16 + $0x38] sm:$0xff]  ;;  %p4709_p5 = pnand %p4708_p8, %p6028_p0 }
 0x162   : > { %4056 = vmatprep.subr.msk.bf16.mxu1 %vm5362_vm6, %v4809_v25  ;;  %4050 = vmatpush3.bf16.msra.mxu0 %v4047_v26  ;;  %vm5401_vm12 = vmpackc.low %vm752_vm11, %vm751_vm10  ;;  %v5478_v52 = vunpack.c.h.bf16 %v3507_v49  ;;  %v3500_v54 = vunpack.c.l.bf16 %v5484_v53  ;;  %v3496_v56 = vunpack.c.l.bf16 %v5492_v55  ;;  %vm771_vm7 = vcmp.eq.s32.totalorder %v5338_v4, 32  ;;  %v822_v26 = vld [vmem:[#allocation16 + $0x18] sm:$0xff] }
 0x163   : > { %4067 = vmatprep.subr.bf16.mxu0 %v4810_v29  ;;  %vm5431_vm2 = vmpackc.low %vm5913_vm0, %vm753_vm15  ;;  %vm772_vm8 = vcmp.eq.s32.totalorder %v5340_v9, 32  ;;  %v3501_v60 = vunpack.c.h.bf16 %v5484_v53  ;;  %v3356_v63 = vsel %vm751_vm10, 1.0, %v4811_v62  ;;  %v3357_v0 = vsel %vm752_vm11, 1.0, %v4811_v62  ;;  %p4710_p11 = pneg %p4709_p5 }
 0x164   : > { %vm5504_vm0 = vmpackc.low %vm772_vm8, %vm771_vm7  ;;  %vm774_vm7 = vcmp.eq.s32.totalorder %v5345_v11, 32  ;;  %v3497_v3 = vunpack.c.h.bf16 %v5492_v55  ;;  %vm785_vm8 = vcmp.eq.s32.totalorder %v5412_v33, 32  ;;  %v3358_v7 = vsel %vm753_vm15, 1.0, %v4811_v62 }
 0x165   : > { %4058 = vmatpush3.bf16.msk.msra.mxu1 %vm5362_vm6, %v4809_v25  ;;  %3708 = vmatmul.mubr.msk.f32.vlgmr.msra.gmra.mrb[0].mxu0 %vm835_vm1, %v828_v28  ;;  %vm5420_vm1 = vmpackc.low %vm730_vm14, %vm729_vm13  ;;  %vm783_vm13 = vcmp.eq.s32.totalorder %v5347_v15, 32  ;;  %vm784_vm14 = vcmp.eq.s32.totalorder %v5349_v16, 32  ;;  %vm5990_vm11 = vcmp.eq.s32.totalorder %v5414_v34, 4294967264  ;;  %v3366_v9 = vsel %vm785_vm8, 1.0, %v4811_v62 }
 0x166   : > { %4060 = vmatprep.subr.msk.bf16.mxu1 %vm5377_vm9, %v4809_v25  ;;  %4068 = vmatpush3.bf16.msra.mxu0 %v4810_v29  ;;  %v3364_v1 = vsel %vm783_vm13, 1.0, %v4811_v62  ;;  %v3365_v2 = vsel %vm784_vm14, 1.0, %v4811_v62  ;;  %v3359_v8 = vsel %vm5990_vm11, 1.0, %v4811_v62  ;;  %vm5991_vm13 = vcmask 130048  }
 0x167   : > { %4069 = vmatprep.subr.bf16.mxu0 %v4810_v29  ;;  %v799_v4 = vadd.f32 %v3364_v1, %v3356_v63  ;;  %v800_v5 = vadd.f32 %v3365_v2, %v3357_v0  ;;  %vm5993_vm15 = vcmask 523264   ;;  %v801_v12 = vadd.f32 %v3366_v9, %v3358_v7 }
 0x168   : > { %vm1401_vm14 = vcmask 261120   ;;  %v5612_v21 = vpack.c.bf16 %v820_v20, %v819_v19  ;;  %v5618_v28 = vpack.c.bf16 %v822_v26, %v821_v22  ;;  %v5623_v33 = vpack.c.bf16 %v824_v32, %v823_v31  ;;  %v2815_v20 = vld [vmem:[#allocation17 + $0x8] sm:$0xff]  ;;  %v2812_v26 = vld [vmem:[%s5308_s5] sm:$0xff] }
 0x169   : > { %4062 = vmatpush3.bf16.msk.msra.mxu1 %vm5377_vm9, %v4809_v25 }
 0x16a   : > { %4070 = vmatpush3.bf16.msra.mxu0 %v4810_v29  ;;  %4064 = vmatprep.subr.msk.bf16.mxu1 %vm5420_vm1, %v4809_v25 }
 0x16b   : > { %4072 = vmatprep.subr.msk.bf16.mxu0 %vm5401_vm12, %v4809_v25 }
 0x16d   : > { %4066 = vmatpush3.bf16.msk.msra.mxu1 %vm5420_vm1, %v4809_v25 }
 0x16e   : > { %4074 = vmatpush3.bf16.msk.msra.mxu0 %vm5401_vm12, %v4809_v25 }
 0x16f   : > { %4076 = vmatprep.subr.msk.bf16.mxu0 %vm5431_vm2, %v4809_v25 }
 0x172   : > { %4078 = vmatpush3.bf16.msk.msra.mxu0 %vm5431_vm2, %v4809_v25 }
 0x238   : > { %v5444_v37 = vpop.f32.mrb[0].mxu0 }
 0x239   : > { %v5446_v38 = vpop.f32.mrb[1].mxu0  ;;  %v5452_v40 = vmax.f32 %v5444_v37, 0.0 }
 0x23a   : > { %v5449_v39 = vmax.f32 %v5446_v38, 0.0 }
 0x23c   : > { %3726 = vmatprep.mubr.msk.f32.mxu1 %vm5912_vm3, %v5449_v39  ;;  %3745 = vmatprep.mubr.msk.f32.mxu0 %vm5912_vm3, %v5449_v39 }
 0x23d   : > { %3727 = vmatmul.mubr.msk.f32.vlgmr.msra.gmra.mrb[0].mxu1 %vm5912_vm3, %v5452_v40  ;;  %3746 = vmatmul.mubr.msk.f32.vlgmr.msra.gmra.mrb[2].mxu0 %vm5912_vm3, %v5452_v40  ;;  %vm773_vm3 = vcmp.eq.s32.totalorder %v5343_v10, 32  ;;  %v5554_v10 = vpack.c.bf16 %v800_v5, %v799_v4 }
 0x23e   : > { %3752 = vmatprep.mubr.msk.f32.mxu1 %vm5914_vm4, %v5464_v42  ;;  %3773 = vmatprep.mubr.msk.f32.mxu0 %vm5914_vm4, %v3500_v54  ;;  %vm5528_vm10 = vmpackc.low %vm774_vm7, %vm773_vm3 }
 0x23f   : > { %vm5992_vm3 = vmmov %vm5991_vm13 }
 0x310   : > { %v3728_v43 = vpop.f32.mrb[0].mxu1  ;;  %v3747_v44 = vpop.f32.mrb[2].mxu0 }
 0x311   : > { %v992_v45 = vpop.f32.mrb[1].mxu1  ;;  %v1067_v46 = vpop.f32.mrb[3].mxu0 }
 0x312   : > { %v4083_v47 = vpack.c.bf16 %v3728_v43, %v992_v45  ;;  %v4079_v48 = vpack.c.bf16 %v3747_v44, %v1067_v46 }
 0x314   : > { %4080 = vmatprep.subr.bf16.mxu1 %v4079_v48 }
 0x315   : > { %4082 = vmatpush3.bf16.msra.mxu1 %v4079_v48 }
 0x316   : > { %4084 = vmatprep.subr.bf16.mxu1 %v4083_v47 }
 0x318   : > { %3753 = vmatmul.mubr.msk.f32.vlgmr.msra.gmra.mrb[2].mxu1 %vm5914_vm4, %v5470_v50 }
 0x319   : > { %4086 = vmatpush3.bf16.msra.mxu1 %v4083_v47  ;;  %3759 = vmatprep.mubr.msk.f32.mxu1 %vm5914_vm4, %v5472_v51 }
 0x320   : > { %3760 = vmatmul.mubr.msk.f32.vlgmr.msra.gmra.mrb[2].mxu1 %vm5914_vm4, %v5478_v52 }
 0x321   : > { %3766 = vmatprep.mubr.msk.f32.mxu1 %vm5914_vm4, %v3496_v56  ;;  %vm786_vm4 = vcmp.eq.s32.totalorder %v5414_v34, 32 }
 0x322   : > { %v3367_v11 = vsel %vm786_vm4, 1.0, %v4811_v62  ;;  %vm5994_vm4 = vmmov %vm5993_vm15 }
 0x323   : > { %v802_v13 = vadd.f32 %v3367_v11, %v3359_v8  ;;  %vm5995_vm7 = vmmov %vm5994_vm4 }
 0x324   : > { %vm5996_vm8 = vmmov %vm5994_vm4 }
 0x325   : > { %v5566_v14 = vpack.c.bf16 %v802_v13, %v801_v12  ;;  %vm5997_vm11 = vmmov %vm5994_vm4 }
 0x3f3   : > { %v3761_v57 = vpop.f32.mrb[2].mxu1 }
 0x3f4   : > { %v1230_v58 = vpop.f32.mrb[3].mxu1 }
 0x3f5   : > { %v4087_v59 = vpack.c.bf16 %v3761_v57, %v1230_v58 }
 0x3f7   : > { %4088 = vmatprep.subr.bf16.mxu1 %v4087_v59  ;;  %4092 = vmatprep.subr.bf16.mxu0 %v4087_v59 }
 0x3f8   : > { %4090 = vmatpush3.bf16.msra.mxu1 %v4087_v59  ;;  %4094 = vmatpush3.bf16.msra.mxu0 %v4087_v59 }
 0x3f9   : > { %4112 = vmatprep.subr.msk.bf16.mxu0 %vm5504_vm0, %v4809_v25  ;;  %4096 = vmatprep.subr.msk.bf16.mxu1 %vm5504_vm0, %v4809_v25 }
 0x3fb   : > { %3774 = vmatmul.mubr.msk.f32.vlgmr.msra.gmra.mrb[4].mxu0 %vm5991_vm13, %v3501_v60  ;;  %3767 = vmatmul.mubr.msk.f32.vlgmr.msra.gmra.mrb[4].mxu1 %vm5992_vm3, %v3497_v3  ;;  %vm5998_vm13 = vmmov %vm5994_vm4 }
 0x3fc   : > { %4114 = vmatpush3.bf16.msk.msra.mxu0 %vm5504_vm0, %v4809_v25  ;;  %3814 = vmatprep.mubr.msk.f32.mxu0 %vm5993_vm15, %v5449_v39  ;;  %vm5999_vm3 = vmmov %vm5994_vm4 }
 0x3fd   : > { %4116 = vmatprep.subr.msk.bf16.mxu0 %vm5528_vm10, %v4809_v25  ;;  %4098 = vmatpush3.bf16.msk.msra.mxu1 %vm5504_vm0, %v4809_v25  ;;  %vm6000_vm15 = vmmov %vm5999_vm3 }
 0x3fe   : > { %4100 = vmatprep.subr.msk.bf16.mxu1 %vm5528_vm10, %v4809_v25 }
 0x400   : > { %4118 = vmatpush3.bf16.msk.msra.mxu0 %vm5528_vm10, %v4809_v25 }
 0x401   : > { %4120 = vmatprep.subr.bf16.mxu0 %v5554_v10  ;;  %4102 = vmatpush3.bf16.msk.msra.mxu1 %vm5528_vm10, %v4809_v25 }
 0x402   : > { %4104 = vmatprep.subr.msk.bf16.mxu1 %vm5357_vm5, %v4809_v25 }
 0x404   : > { %4122 = vmatpush3.bf16.msra.mxu0 %v5554_v10 }
 0x405   : > { %4124 = vmatprep.subr.bf16.mxu0 %v5566_v14 }
 0x408   : > { %4126 = vmatpush3.bf16.msra.mxu0 %v5566_v14 }
 0x409   : > { %4144 = vmatprep.subr.msk.bf16.mxu0 %vm5357_vm5, %v4809_v25 }
 0x40b   : > { %3815 = vmatmul.mubr.msk.f32.vlgmr.msra.gmra.mrb[6].mxu0 %vm5994_vm4, %v5452_v40  ;;  %v825_v40 = vld [vmem:[#allocation16 + $0x30] sm:$0xff]  ;;  %vm6001_vm4 = vcmask 130048  }
 0x40c   : > { %4146 = vmatpush3.bf16.msk.msra.mxu0 %vm5357_vm5, %v4809_v25  ;;  %v5628_v43 = vpack.c.bf16 %v826_v41, %v825_v40 }
 0x40d   : > { %4148 = vmatprep.subr.msk.bf16.mxu0 %vm5362_vm6, %v4809_v25 }
 0x410   : > { %4150 = vmatpush3.bf16.msk.msra.mxu0 %vm5362_vm6, %v4809_v25 }
 0x411   : > { %4152 = vmatprep.subr.msk.bf16.mxu0 %vm5377_vm9, %v4809_v25 }
 0x414   : > { %4154 = vmatpush3.bf16.msk.msra.mxu0 %vm5377_vm9, %v4809_v25 }
 0x415   : > { %4156 = vmatprep.subr.msk.bf16.mxu0 %vm5420_vm1, %v4809_v25 }
 0x418   : > { %4158 = vmatpush3.bf16.msk.msra.mxu0 %vm5420_vm1, %v4809_v25 }
 0x4ce   : > { %v3775_v15 = vpop.f32.mrb[4].mxu0  ;;  %v3768_v16 = vpop.f32.mrb[4].mxu1 }
 0x4cf   : > { %v1392_v17 = vpop.f32.mrb[5].mxu0  ;;  %v1311_v18 = vpop.f32.mrb[5].mxu1 }
 0x4d0   : > { %3784 = vmatprep.mubr.msk.f32.mxu1 %vm1401_vm14, %v1392_v17 }
 0x4d1   : > { %3785 = vmatmul.mubr.msk.f32.vlgmr.msra.gmra.mrb[6].mxu1 %vm1401_vm14, %v3775_v15 }
 0x4d2   : > { %4106 = vmatpush3.bf16.msk.msra.mxu1 %vm5357_vm5, %v4809_v25  ;;  %3795 = vmatprep.mubr.msk.f32.mxu1 %vm1401_vm14, %v1311_v18  ;;  %v2819_v18 = vld [vmem:[%s6018_s14 + $0x18] sm:$0xff] }
 0x4d3   : > { %4108 = vmatprep.subr.msk.bf16.mxu1 %vm5362_vm6, %v4809_v25 }
 0x4d6   : > { %4110 = vmatpush3.bf16.msk.msra.mxu1 %vm5362_vm6, %v4809_v25 }
 0x4d7   : > { %4128 = vmatprep.subr.bf16.mxu1 %v5612_v21 }
 0x4d9   : > { %3796 = vmatmul.mubr.msk.f32.vlgmr.msra.gmra.mrb[6].mxu1 %vm1401_vm14, %v3768_v16  ;;  %v2817_v16 = vld [vmem:[%s6018_s14 + $0x8] sm:$0xff] }
 0x4da   : > { %4130 = vmatpush3.bf16.msra.mxu1 %v5612_v21 }
 0x4db   : > { %4132 = vmatprep.subr.bf16.mxu1 %v5618_v28 }
 0x4de   : > { %v3816_v34 = vpop.f32.mrb[6].mxu0  ;;  %4134 = vmatpush3.bf16.msra.mxu1 %v5618_v28 }
 0x4df   : > { %v1630_v39 = vpop.f32.mrb[7].mxu0  ;;  %4136 = vmatprep.subr.bf16.mxu1 %v5623_v33 }
 0x4e2   : > { %4138 = vmatpush3.bf16.msra.mxu1 %v5623_v33 }
 0x4e3   : > { %4140 = vmatprep.subr.bf16.mxu1 %v5628_v43 }
 0x4e6   : > { %4142 = vmatpush3.bf16.msra.mxu1 %v5628_v43 }
 0x4e7   : > { %4159 = vmatprep.subr.bf16.mxu1 %v4810_v29 }
 0x5ac   : > { %v3797_v44 = vpop.f32.mrb[6].mxu1 }
 0x5ad   : > { %v1640_v45 = vsub.f32 %v3797_v44, %v3816_v34  ;;  %v1555_v46 = vpop.f32.mrb[7].mxu1 }
 0x5ae   : > { %v1639_v47 = vsub.f32 %v1555_v46, %v1630_v39 }
 0x5b0   : > { %3833 = vmatprep.mubr.msk.f32.mxu1 %vm5995_vm7, %v1639_v47  ;;  %vm6002_vm7 = vmmov %vm6001_vm4 }
 0x5b1   : > { %3834 = vmatmul.mubr.msk.f32.vlgmr.msra.gmra.mrb[8].mxu1 %vm5996_vm8, %v1640_v45  ;;  %vm6003_vm8 = vmmov %vm6001_vm4 }
 0x5b2   : > { %4160 = vmatpush3.bf16.msra.mxu1 %v4810_v29 }
 0x5b3   : > { %4161 = vmatprep.subr.bf16.mxu1 %v4810_v29 }
 0x5b6   : > { %4162 = vmatpush3.bf16.msra.mxu1 %v4810_v29 }
 0x5b7   : > { %4164 = vmatprep.subr.msk.bf16.mxu1 %vm5401_vm12, %v4809_v25 }
 0x5ba   : > { %4166 = vmatpush3.bf16.msk.msra.mxu1 %vm5401_vm12, %v4809_v25 }
 0x5bb   : > { %4168 = vmatprep.subr.msk.bf16.mxu1 %vm5431_vm2, %v4809_v25 }
 0x5be   : > { %4170 = vmatpush3.bf16.msk.msra.mxu1 %vm5431_vm2, %v4809_v25 }
 0x5bf   : > { %4188 = vmatprep.subr.msk.bf16.mxu1 %vm5504_vm0, %v4809_v25 }
 0x684   : > { %v3835_v48 = vpop.f32.mrb[8].mxu1 }
 0x685   : > { %v1723_v49 = vadd.f32 %v3835_v48, %v5444_v37  ;;  %v1713_v57 = vpop.f32.mrb[9].mxu1 }
 0x686   : > { %v1722_v58 = vadd.f32 %v1713_v57, %v5446_v38 }
 0x687   : > { %v1725_v63 = vmax.f32 %v1723_v49, 0.0 }
 0x688   : > { %v1724_v59 = vmax.f32 %v1722_v58, 0.0 }
 0x68a   : > { %3852 = vmatprep.mubr.msk.f32.mxu0 %vm5997_vm11, %v1724_v59  ;;  %3871 = vmatprep.mubr.msk.f32.mxu1 %vm5998_vm13, %v1724_v59  ;;  %vm6004_vm11 = vmmov %vm6001_vm4 }
 0x68b   : > { %3853 = vmatmul.mubr.msk.f32.vlgmr.msra.gmra.mrb[8].mxu0 %vm5999_vm3, %v1725_v63  ;;  %3872 = vmatmul.mubr.msk.f32.vlgmr.msra.gmra.mrb[10].mxu1 %vm6000_vm15, %v1725_v63  ;;  %vm6005_vm13 = vmmov %vm6001_vm4 }
 0x68c   : > { %3878 = vmatprep.mubr.msk.f32.mxu0 %vm6001_vm4, %v5464_v42  ;;  %4190 = vmatpush3.bf16.msk.msra.mxu1 %vm5504_vm0, %v4809_v25  ;;  %vm6006_vm3 = vmmov %vm6001_vm4 }
 0x68d   : > { %4192 = vmatprep.subr.msk.bf16.mxu1 %vm5528_vm10, %v4809_v25  ;;  %vm6007_vm15 = vmmov %vm6006_vm3 }
 0x68e   : > { %vm6008_vm4 = vmmov %vm6006_vm3 }
 0x690   : > { %4194 = vmatpush3.bf16.msk.msra.mxu1 %vm5528_vm10, %v4809_v25 }
 0x691   : > { %4196 = vmatprep.subr.msk.bf16.mxu1 %vm5357_vm5, %v4809_v25 }
 0x75e   : > { %v3854_v0 = vpop.f32.mrb[8].mxu0  ;;  %v3873_v1 = vpop.f32.mrb[10].mxu1 }
 0x75f   : > { %v1798_v2 = vpop.f32.mrb[9].mxu0  ;;  %v1873_v4 = vpop.f32.mrb[11].mxu1 }
 0x760   : > { %v4175_v5 = vpack.c.bf16 %v3854_v0, %v1798_v2  ;;  %v4171_v7 = vpack.c.bf16 %v3873_v1, %v1873_v4 }
 0x762   : > { %4172 = vmatprep.subr.bf16.mxu0 %v4171_v7 }
 0x763   : > { %4174 = vmatpush3.bf16.msra.mxu0 %v4171_v7 }
 0x764   : > { %4176 = vmatprep.subr.bf16.mxu0 %v4175_v5 }
 0x766   : > { %3879 = vmatmul.mubr.msk.f32.vlgmr.msra.gmra.mrb[10].mxu0 %vm6002_vm7, %v5470_v50  ;;  %vm6009_vm7 = vcmask 523264  }
 0x767   : > { %4178 = vmatpush3.bf16.msra.mxu0 %v4175_v5  ;;  %3885 = vmatprep.mubr.msk.f32.mxu0 %vm6003_vm8, %v5472_v51 }
 0x76e   : > { %3886 = vmatmul.mubr.msk.f32.vlgmr.msra.gmra.mrb[10].mxu0 %vm6004_vm11, %v5478_v52 }
 0x76f   : > { %3892 = vmatprep.mubr.msk.f32.mxu0 %vm6005_vm13, %v3496_v56 }
 0x841   : > { %v3887_v8 = vpop.f32.mrb[10].mxu0 }
 0x842   : > { %v2023_v9 = vpop.f32.mrb[11].mxu0 }
 0x843   : > { %v4179_v11 = vpack.c.bf16 %v3887_v8, %v2023_v9 }
 0x845   : > { %4180 = vmatprep.subr.bf16.mxu0 %v4179_v11 }
 0x846   : > { %4182 = vmatpush3.bf16.msra.mxu0 %v4179_v11 }
 0x847   : > { %4184 = vmatprep.subr.bf16.mxu0 %v4179_v11 }
 0x849   : > { %3893 = vmatmul.mubr.msk.f32.vlgmr.msra.gmra.mrb[12].mxu0 %vm6006_vm3, %v3497_v3 }
 0x84a   : > { %4186 = vmatpush3.bf16.msra.mxu0 %v4179_v11  ;;  %3899 = vmatprep.mubr.msk.f32.mxu0 %vm6007_vm15, %v3500_v54 }
 0x84b   : > { %4204 = vmatprep.subr.msk.bf16.mxu0 %vm5504_vm0, %v4809_v25 }
 0x84d   : > { %3900 = vmatmul.mubr.msk.f32.vlgmr.msra.gmra.mrb[14].mxu0 %vm6008_vm4, %v3501_v60  ;;  %vm4812_vm4 = vmmov 0  }
 0x84e   : > { %4206 = vmatpush3.bf16.msk.msra.mxu0 %vm5504_vm0, %v4809_v25  ;;  %3940 = vmatprep.mubr.msk.f32.mxu0 %vm6009_vm7, %v1724_v59  ;;  %vm6010_vm0 = vmmov %vm6009_vm7 }
 0x84f   : > { %4208 = vmatprep.subr.msk.bf16.mxu0 %vm5528_vm10, %v4809_v25 }
 0x852   : > { %4210 = vmatpush3.bf16.msk.msra.mxu0 %vm5528_vm10, %v4809_v25  ;;  %vm6016_vm10 = vmmov %vm6010_vm0 }
 0x853   : > { %4212 = vmatprep.subr.bf16.mxu0 %v5554_v10 }
 0x856   : > { %4214 = vmatpush3.bf16.msra.mxu0 %v5554_v10 }
 0x857   : > { %4216 = vmatprep.subr.bf16.mxu0 %v5566_v14 }
 0x85a   : > { %4218 = vmatpush3.bf16.msra.mxu0 %v5566_v14 }
 0x85b   : > { %4236 = vmatprep.subr.msk.bf16.mxu0 %vm5357_vm5, %v4809_v25 }
 0x85d   : > { %3941 = vmatmul.mubr.msk.f32.vlgmr.msra.gmra.mrb[16].mxu0 %vm6010_vm0, %v1725_v63 }
 0x85e   : > { %4238 = vmatpush3.bf16.msk.msra.mxu0 %vm5357_vm5, %v4809_v25 }
 0x85f   : > { %4240 = vmatprep.subr.msk.bf16.mxu0 %vm5362_vm6, %v4809_v25 }
 0x862   : > { %4242 = vmatpush3.bf16.msk.msra.mxu0 %vm5362_vm6, %v4809_v25 }
 0x863   : > { %4244 = vmatprep.subr.msk.bf16.mxu0 %vm5377_vm9, %v4809_v25 }
 0x866   : > { %4246 = vmatpush3.bf16.msk.msra.mxu0 %vm5377_vm9, %v4809_v25  ;;  %vm6013_vm9 = vmmov %vm6010_vm0 }
 0x867   : > { %4248 = vmatprep.subr.msk.bf16.mxu0 %vm5420_vm1, %v4809_v25 }
 0x86a   : > { %4250 = vmatpush3.bf16.msk.msra.mxu0 %vm5420_vm1, %v4809_v25  ;;  %vm6015_vm1 = vmmov %vm6010_vm0 }
 0x91c   : > { %v3894_v53 = vpop.f32.mrb[12].mxu0 }
 0x91d   : > { %v2098_v54 = vpop.f32.mrb[13].mxu0 }
 0x920   : > { %v3901_v55 = vpop.f32.mrb[14].mxu0 }
 0x921   : > { %v2173_v56 = vpop.f32.mrb[15].mxu0 }
 0x922   : > { %3910 = vmatprep.mubr.msk.f32.mxu1 %vm1401_vm14, %v2173_v56 }
 0x923   : > { %3911 = vmatmul.mubr.msk.f32.vlgmr.msra.gmra.mrb[12].mxu1 %vm1401_vm14, %v3901_v55 }
 0x924   : > { %4198 = vmatpush3.bf16.msk.msra.mxu1 %vm5357_vm5, %v4809_v25  ;;  %3921 = vmatprep.mubr.msk.f32.mxu1 %vm1401_vm14, %v2098_v54  ;;  %vm6011_vm5 = vmmov %vm6010_vm0 }
 0x925   : > { %4200 = vmatprep.subr.msk.bf16.mxu1 %vm5362_vm6, %v4809_v25 }
 0x928   : > { %4202 = vmatpush3.bf16.msk.msra.mxu1 %vm5362_vm6, %v4809_v25  ;;  %vm6012_vm6 = vmmov %vm6010_vm0 }
 0x929   : > { %4220 = vmatprep.subr.bf16.mxu1 %v5612_v21 }
 0x92b   : > { %3922 = vmatmul.mubr.msk.f32.vlgmr.msra.gmra.mrb[12].mxu1 %vm1401_vm14, %v3894_v53 }
 0x92c   : > { %4222 = vmatpush3.bf16.msra.mxu1 %v5612_v21 }
 0x92d   : > { %4224 = vmatprep.subr.bf16.mxu1 %v5618_v28 }
 0x930   : > { %v3942_v23 = vpop.f32.mrb[16].mxu0  ;;  %4226 = vmatpush3.bf16.msra.mxu1 %v5618_v28  ;;  %v3482_v28 = vld [vmem:[%s6024_s3] ss:$0 sm:$0xff] }
 0x931   : > { %v2410_v27 = vpop.f32.mrb[17].mxu0  ;;  %4228 = vmatprep.subr.bf16.mxu1 %v5623_v33 }
 0x934   : > { %4230 = vmatpush3.bf16.msra.mxu1 %v5623_v33 }
 0x935   : > { %4232 = vmatprep.subr.bf16.mxu1 %v5628_v43 }
 0x938   : > { %4234 = vmatpush3.bf16.msra.mxu1 %v5628_v43  ;;  %v2993_v43 = vld [vmem:[%s621_s10] sm:$0xff]  ;;  %s3069_s10 = scalar_lea.sflag [#allocation4], %s5297_s29 }
 0x939   : > { %4251 = vmatprep.subr.bf16.mxu1 %v4810_v29 }
 0x9fe   : > { %v3923_v24 = vpop.f32.mrb[12].mxu1 }
 0x9ff   : > { %v2420_v35 = vsub.f32 %v3923_v24, %v3942_v23  ;;  %v2335_v60 = vpop.f32.mrb[13].mxu1 }
 0xa00   : > { %v2419_v61 = vsub.f32 %v2335_v60, %v2410_v27 }
 0xa02   : > { %3959 = vmatprep.mubr.msk.f32.mxu1 %vm6011_vm5, %v2419_v61 }
 0xa03   : > { %3960 = vmatmul.mubr.msk.f32.vlgmr.msra.gmra.mrb[14].mxu1 %vm6012_vm6, %v2420_v35 }
 0xa04   : > { %4252 = vmatpush3.bf16.msra.mxu1 %v4810_v29 }
 0xa05   : > { %4253 = vmatprep.subr.bf16.mxu1 %v4810_v29 }
 0xa08   : > { %4254 = vmatpush3.bf16.msra.mxu1 %v4810_v29 }
 0xa09   : > { %4256 = vmatprep.subr.msk.bf16.mxu1 %vm5401_vm12, %v4809_v25 }
 0xa0c   : > { %4258 = vmatpush3.bf16.msk.msra.mxu1 %vm5401_vm12, %v4809_v25  ;;  %vm6014_vm12 = vmmov %vm6010_vm0 }
 0xa0d   : > { %4260 = vmatprep.subr.msk.bf16.mxu1 %vm5431_vm2, %v4809_v25 }
 0xa10   : > { %4262 = vmatpush3.bf16.msk.msra.mxu1 %vm5431_vm2, %v4809_v25  ;;  %vm6017_vm2 = vmmov %vm6006_vm3 }
 0xa11   : > { %4283 = vmatprep.subr.bf16.mxu1 %v4810_v29  ;;  %vm6019_vm8 = vmmov %vm6017_vm2 }
 0xa12   : > { %vm6020_vm11 = vmmov %vm6017_vm2 }
 0xa13   : > { %vm6021_vm13 = vmmov %vm6017_vm2 }
 0xa14   : > { %vm6022_vm3 = vmmov %vm6017_vm2 }
 0xa15   : > { %vm6023_vm15 = vmmov %vm6017_vm2 }
 0xa16   : > { %vm6026_vm7 = vmmov %vm6017_vm2 }
 0xad6   : > { %v3961_v3 = vpop.f32.mrb[14].mxu1 }
 0xad7   : > { %v2503_v6 = vadd.f32 %v3961_v3, %v5444_v37  ;;  %v2493_v10 = vpop.f32.mrb[15].mxu1 }
 0xad8   : > { %v2502_v12 = vadd.f32 %v2493_v10, %v5446_v38  ;;  %v2816_v38 = vld [vmem:[%s6018_s14] sm:$0xff] }
 0xad9   : > { %v2505_v14 = vmax.f32 %v2503_v6, 0.0  ;;  %v4271_v17 = vpack.c.bf16 %v2817_v16, %v2816_v38 }
 0xada   : > { %v2504_v13 = vmax.f32 %v2502_v12, 0.0 }
 0xadc   : > { %3978 = vmatprep.mubr.msk.f32.mxu0 %vm6013_vm9, %v2504_v13  ;;  %3997 = vmatprep.mubr.msk.f32.mxu1 %vm6014_vm12, %v2504_v13 }
 0xadd   : > { %3979 = vmatmul.mubr.msk.f32.vlgmr.msra.gmra.mrb[18].mxu0 %vm6015_vm1, %v2505_v14  ;;  %3998 = vmatmul.mubr.msk.f32.vlgmr.msra.gmra.mrb[16].mxu1 %vm6016_vm10, %v2505_v14 }
 0xade   : > { %4004 = vmatprep.mubr.msk.f32.mxu0 %vm6017_vm2, %v5464_v42  ;;  %v2818_v42 = vld [vmem:[%s6018_s14 + $0x10] sm:$0xff]  ;;  %4036 = vmatprep.mubr.msk.f32.mxu1 %vm4812_vm4, %v4811_v62 }
 0xadf   : > { %v4275_v19 = vpack.c.bf16 %v2819_v18, %v2818_v42 }
 0xbb0   : > { %v3980_v25 = vpop.f32.mrb[18].mxu0  ;;  %v3999_v29 = vpop.f32.mrb[16].mxu1 }
 0xbb1   : > { %v2578_v30 = vpop.f32.mrb[19].mxu0  ;;  %v2653_v36 = vpop.f32.mrb[17].mxu1 }
 0xbb2   : > { %v4267_v37 = vpack.c.bf16 %v3980_v25, %v2578_v30  ;;  %v4263_v15 = vpack.c.bf16 %v3999_v29, %v2653_v36 }
 0xbb4   : > { %4264 = vmatprep.subr.bf16.mxu0 %v4263_v15 }
 0xbb5   : > { %4266 = vmatpush3.bf16.msra.mxu0 %v4263_v15 }
 0xbb6   : > { %4268 = vmatprep.subr.bf16.mxu0 %v4267_v37 }
 0xbb8   : > { %4005 = vmatmul.mubr.msk.f32.vlgmr.msra.gmra.mrb[20].mxu0 %vm6019_vm8, %v5470_v50  ;;  %v2814_v50 = vld [vmem:[#allocation17] sm:$0xff] }
 0xbb9   : > { %4270 = vmatpush3.bf16.msra.mxu0 %v4267_v37  ;;  %4011 = vmatprep.mubr.msk.f32.mxu0 %vm6020_vm11, %v5472_v51  ;;  %v4279_v51 = vpack.c.bf16 %v2815_v20, %v2814_v50 }
 0xbba   : > { %4272 = vmatprep.subr.bf16.mxu0 %v4271_v17 }
 0xbc0   : > { %4012 = vmatmul.mubr.msk.f32.vlgmr.msra.gmra.mrb[20].mxu0 %vm6021_vm13, %v5478_v52  ;;  %v2813_v52 = vld [vmem:[%s5308_s5 + $0x8] sm:$0xff]  ;;  %s3485_s5 = sshll.u32 %s5969_s16, 7  ;;  %s4813_s16 = smov [#allocation19]  }
 0xbc1   : > { %4274 = vmatpush3.bf16.msra.mxu0 %v4271_v17  ;;  %s5817_s21 = scalar_lea.hbm %s6027_s30, %s3485_s5  ;;  %s4711_s22 = sshll.u32 %s4813_s16, 4  ;;  %s4712_s22 = int_to_ptr.vmem [resolvable:$false] %s4711_s22 }
 0xbc2   : > { %4276 = vmatprep.subr.bf16.mxu0 %v4275_v19  ;;  %s4713_s23 = scalar_lea.vmem %s4712_s22, 256  ;;  %p4714_p1 = scmp.lt.s32.totalorder %s5819_s28, %s4712_s22 }
 0xbc3   : > { %p4715_p12 = scmp.lt.s32.totalorder %s4713_s23, %s4707_s17 }
 0xbc5   : > { %4278 = vmatpush3.bf16.msra.mxu0 %v4275_v19  ;;  %p4716_p6 = por %p4715_p12, %p4714_p1 }
 0xbc6   : > { %4280 = vmatprep.subr.bf16.mxu0 %v4279_v51 }
 0xbc7   : > { %p4717_p7 = pnand %p4716_p6, %p4710_p11 }
 0xc93   : > { %v4013_v21 = vpop.f32.mrb[20].mxu0 }
 0xc94   : > { %v2803_v22 = vpop.f32.mrb[21].mxu0 }
 0xc95   : > { %4022 = vmatprep.mubr.msk.f32.mxu0 %vm1401_vm14, %v2803_v22 }
 0xc96   : > { %4023 = vmatmul.mubr.msk.f32.vlgmr.msra.gmra.mrb[22].mxu0 %vm1401_vm14, %v4013_v21 }
 0xc97   : > { %4282 = vmatpush3.bf16.msra.mxu0 %v4279_v51  ;;  %4029 = vmatprep.mubr.msk.f32.mxu0 %vm6022_vm3, %v2812_v26 }
 0xc9e   : > { %4030 = vmatmul.mubr.msk.f32.vlgmr.msra.gmra.mrb[22].mxu0 %vm6023_vm15, %v2813_v52 }
 0xd71   : > { %v4031_v31 = vpop.f32.mrb[22].mxu0 }
 0xd72   : > { %v2990_v32 = vadd.f32 %v4031_v31, %v3482_v28  ;;  %v2973_v33 = vpop.f32.mrb[23].mxu0 }
 0xd73   : > { %v2989_v34 = vadd.f32 %v3482_v28, %v2973_v33 }
 0xd74   : > { %v2992_v39 = vmax.f32 %v2990_v32, 0.0 }
 0xd75   : > { %v2991_v40 = vmax.f32 %v2989_v34, 0.0 }
 0xd77   : > { %v4284_v41 = vpack.c.bf16 %v2992_v39, %v2991_v40 }
 0xd79   : > { %4285 = vmatpush3.bf16.msra.mxu1 %v4284_v41 }
 0xd7c   : > { %4037 = vmatmul.mubr.msk.f32.vlgmr.msra.gmra.mrb[18].mxu1 %vm6026_vm7, %v2993_v43 }
 0xe4f   : > { %v3063_v62 = vpop.f32.mrb[18].mxu1 }
 0xe50   : > { %3067 = vst.msk [vmem:[%s703_s1] sm:$0xff] %vm1401_vm14, %v3063_v62  ;;  %v4038_v44 = vpop.f32.mrb[19].mxu1 }
 0xe51   : > { %4720 = shalt.err (!%p4717_p7)
}
 0xe52   : > { %s4721_s29 = scalar_lea.hbm %s5817_s21, 128  ;;  %s4725_s25 = scalar_lea.hbm %s6027_s30, 256 }
 0xe53   : > { %p4722_p4 = scmp.ne.s32.totalorder %s5817_s21, %s4721_s29  ;;  %p4726_p2 = scmp.lt.u32.totalorder %s5817_s21, %s6027_s30 }
 0xe54   : > { %p4727_p9 = scmp.lt.u32.totalorder %s4725_s25, %s4721_s29  ;;  %p4729_p8 = scmp.lt.u32.totalorder %s4721_s29, %s5817_s21 }
 0xe55   : > { %p4723_p13 = pnand %p4722_p4, %p6028_p0 }
 0xe56   : > { %p4728_p10 = por %p4727_p9, %p4726_p2 }
 0xe57   : > { %p4724_p3 = pneg %p4723_p13 }
 0xe58   : > { %p4730_p5 = por %p4729_p8, %p4728_p10 }
 0xe5a   : > { %p4731_p11 = pnand %p4730_p5, %p4724_p3 }
 0xe5c   : > { %4734 = shalt.err (!%p4731_p11)
}
 0xe5d   : > { %4324 = dma.vmem_to_hbm [thread:$0]  (%p6028_p0), %s5819_s28, 128, %s5817_s21, %s3069_s10  }
 0xe5e PF: > { %s6029_s12 = sld [smem:[#allocation27_spill]]  ;;  %s6030_s27 = sld [smem:[#allocation35_spill]] }
 0xe5f   : > { %p6032_p12 = scmp.ge.s32.totalorder %s4793_s24, 2 }
 0xe64   : > { %s3094_s7 = sand.u32 1, %s6029_s12   ;;  %p6031_p1 = scmp.ne.s32.totalorder %s6030_s27, 0 }
 0xe65   : > { %s3095_s3 = scalar_lea.sflag [#allocation4], %s3094_s7 }
 0xe66   : > { %p4359_p6 = pnand %p6032_p12, %p6031_p1 }
 0xe68   : > { %4776 = dma.done.wait (!%p4359_p6), %s3095_s3, 128  }
 0xe69   : > { %4778 = vsyncadd (!%p4359_p6), %s3095_s3, 4294967168  ;;  %s6033_s24 = sld [smem:[#allocation31_spill]]  ;;  %s6034_s21 = sld [smem:[#allocation28_spill]] }
 0xe6a   : > { %s6035_s22 = sld [smem:[#allocation29_spill]]  ;;  %s6036_s23 = sld [smem:[#allocation32_spill]] }
 0xe6f   : > { %p36_p7 = scmp.ge.s32.totalorder %s6033_s24, 4  }
 0xe71   :  { %38 = sbr.rel (!%p36_p7) target bundleno = 22 (0x16), region = 197 }
 0xe78   :  { %3100 = vsyncpa [#allocation3], 1 }
 0xe79   :  { %3102 = vsyncpa [#allocation3 + $0x1], 1 }
 0xe7a   :  { %3103 = vsyncpa [#allocation6], 1 }
 0xe7b   :  { %3105 = vsyncpa [#allocation6 + $0x1], 1 }
 0xe7c   :  { %3106 = vsyncpa [#allocation9], 1 }
 0xe7d   :  { %3108 = vsyncpa [#allocation9 + $0x1], 1 }
 0xe7e   :  { %3109 = vsyncpa [#allocation12], 1 }
 0xe7f   :  { %3111 = vsyncpa [#allocation12 + $0x1], 1 }
 0xe80   :  { %3112 = vsyncpa [#allocation15], 1 }
 0xe81   :  { %3113 = vsyncpa [#allocation18], 1 }
 0xe82   :  { %3114 = vsyncpa [#allocation4], 1 }
 0xe83   :  { %3116 = vsyncpa [#allocation4 + $0x1], 1 }

</bundles_post_ra>
